<compile_context>
chip_gen: v5e
topology: v5e:2x2
jax: 0.10.0
libtpu: 0.0.40
codegen_flags: <defaults>
</compile_context>

<pallas_src>
import functools

import jax
import jax.numpy as jnp
from jax.experimental import pallas as pl
from jax.experimental.pallas import tpu as pltpu


def dynamics_lstm_kernel(
    static_ref,            # (TB, S)
    seq_ref,               # (T, TB, F)   time-major, batch tile
    w1_ref, b1_ref,        # static encoder layer 1: (S, H), (1, H)
    w2_ref, b2_ref,        # static encoder layer 2: (H, H), (1, H)
    wih0_ref, bl0_ref,     # LSTM layer 0 input proj: (F, 4H), (1, 4H)   [g-cols pre-scaled x2]
    whh0_ref,              # LSTM layer 0 recurrent:  (H, 4H)            [g-cols pre-scaled x2]
    wih1_ref, whh1_ref, bl1_ref,   # LSTM layer 1: (H, 4H), (H, 4H), (1, 4H)  [g-cols x2]
    wp1s_ref, wp1d_ref, bp1_ref,   # predictor layer 1 split over concat: (H, H), (H, H), (1, H)
    wp2_ref, bp2_ref,      # predictor layer 2 (output padded to Op): (H, Op), (1, Op)
    out_ref,               # (TB, Op)   lane-dense output slab
    xproj_ref,             # VMEM scratch (T*TB, 4H): layer-0 input projection for all steps
    *, T, TB, H,
):
    f32 = jnp.float32

    # ---- static encoder: Linear -> ReLU -> Linear ----
    s = static_ref[...]
    x = jnp.maximum(jnp.dot(s, w1_ref[...], preferred_element_type=f32) + b1_ref[...], 0.0)
    static_feat = jnp.dot(x, w2_ref[...], preferred_element_type=f32) + b2_ref[...]

    # ---- layer-0 input projection for ALL timesteps in one matmul (bias fused),
    #      parked in VMEM so the unrolled loop doesn't hold T*4H live vregs ----
    seq_flat = seq_ref[...].reshape(T * TB, -1)
    xproj_ref[...] = (jnp.dot(seq_flat, wih0_ref[...], preferred_element_type=f32)
                      + bl0_ref[...])

    # bias broadcast hoisted once (single vreg), weights re-read from refs per step
    bl1_b = jnp.broadcast_to(bl1_ref[...], (TB, 4 * H))

    def gates_to_hc(gates, c):
        # Single full-width EUP pass; the g-gate columns were pre-scaled by 2 in the
        # wrapper so tanh(x) = 2*sigmoid(2x) - 1 comes for free from the same sigmoid.
        sig = jax.nn.sigmoid(gates)
        i = sig[:, 0 * H:1 * H]
        f = sig[:, 1 * H:2 * H]
        g = 2.0 * sig[:, 2 * H:3 * H] - 1.0
        o = sig[:, 3 * H:4 * H]
        c_new = f * c + i * g
        h_new = o * jnp.tanh(c_new)
        return h_new, c_new

    c0 = jnp.zeros((TB, H), f32)
    h1 = jnp.zeros((TB, H), f32)
    c1 = jnp.zeros((TB, H), f32)

    # ---- fully unrolled 2-layer LSTM recurrence, wavefront-interleaved ----
    # h0_{-1} = 0, so step 0's layer-0 gates are just xproj[0].
    g0 = xproj_ref[0:TB, :]
    for t in range(T):
        h0, c0 = gates_to_hc(g0, c0)

        # Issue layer-0's dot for step t+1 as soon as h0_t exists, BEFORE layer-1(t)'s
        # activations: layer-1(t) and layer-0(t+1) only share h0_t, so their MXU/EUP
        # chains can overlap now that no VMEM round-trip orders them.
        if t + 1 < T:
            g0 = (xproj_ref[(t + 1) * TB:(t + 2) * TB, :]
                  + jnp.dot(h0, whh0_ref[...], preferred_element_type=f32))

        # layer-1: two register-resident dots (no cat_ref); h1_{-1} = 0 -> skip dead dot at t=0
        if t == 0:
            g1 = jnp.dot(h0, wih1_ref[...], preferred_element_type=f32) + bl1_b
        else:
            g1 = (jnp.dot(h0, wih1_ref[...], preferred_element_type=f32)
                  + jnp.dot(h1, whh1_ref[...], preferred_element_type=f32)
                  + bl1_b)
        h1, c1 = gates_to_hc(g1, c1)

    dyn_feat = h1

    # ---- predictor on fused = concat([static_feat, h_last], -1) ----
    # concat @ Wp1 computed as static_feat @ Wp1[:H] + h_last @ Wp1[H:] (no in-kernel concat).
    hidden = jnp.maximum(
        jnp.dot(static_feat, wp1s_ref[...], preferred_element_type=f32)
        + jnp.dot(dyn_feat, wp1d_ref[...], preferred_element_type=f32)
        + bp1_ref[...], 0.0)
    out = jnp.dot(hidden, wp2_ref[...], preferred_element_type=f32) + bp2_ref[...]
    out_ref[...] = out.astype(out_ref.dtype)     # (TB, Op) lane-dense unmasked store


def init_params(key, static_dim, seq_feature_dim, hidden_dim, output_horizon, output_dim):
    H = hidden_dim
    O = output_horizon * output_dim
    keys = jax.random.split(key, 14)
    u = lambda k, shape: jax.random.uniform(k, shape, jnp.float32, -0.1, 0.1)
    return {
        # static encoder
        "w1": u(keys[0], (static_dim, H)), "b1": u(keys[1], (H,)),
        "w2": u(keys[2], (H, H)),          "b2": u(keys[3], (H,)),
        # LSTM layer 0 (PyTorch W_ih/W_hh transposed to x @ W orientation; b = b_ih + b_hh)
        "wih0": u(keys[4], (seq_feature_dim, 4 * H)),
        "whh0": u(keys[5], (H, 4 * H)),
        "bl0":  u(keys[6], (4 * H,)),
        # LSTM layer 1
        "wih1": u(keys[7], (H, 4 * H)),
        "whh1": u(keys[8], (H, 4 * H)),
        "bl1":  u(keys[9], (4 * H,)),
        # predictor
        "wp1": u(keys[10], (2 * H, H)), "bp1": u(keys[11], (H,)),
        "wp2": u(keys[12], (H, O)),     "bp2": u(keys[13], (O,)),
    }


@functools.partial(jax.jit, static_argnames=("output_horizon", "output_dim"))
def dynamics_lstm_forward(static_input, sequence_input, params, *, output_horizon, output_dim):
    B, S = static_input.shape
    _, T, F = sequence_input.shape
    H = params["w1"].shape[1]
    O = output_horizon * output_dim

    LANE = 128
    TILE_B = 8                                       # one sublane tile per grid program
    Bp = max(TILE_B, ((B + TILE_B - 1) // TILE_B) * TILE_B)
    Op = ((O + LANE - 1) // LANE) * LANE             # lane-dense output slab

    # wrapper-side layout plumbing (zero-cost relative to the kernel at these shapes)
    static_p = jnp.pad(static_input, ((0, Bp - B), (0, 0)))
    seq_tbf = jnp.transpose(sequence_input, (1, 0, 2))          # (T, B, F)
    seq_p = jnp.pad(seq_tbf, ((0, 0), (0, Bp - B), (0, 0)))     # (T, Bp, F)

    def scale_g(w):
        # Pre-scale the g-gate quarter by 2 so the kernel gets tanh from one sigmoid pass.
        return jnp.concatenate(
            [w[..., :2 * H], 2.0 * w[..., 2 * H:3 * H], w[..., 3 * H:]], axis=-1)

    wih0 = scale_g(params["wih0"]); whh0 = scale_g(params["whh0"]); bl0 = scale_g(params["bl0"])
    wih1 = scale_g(params["wih1"]); whh1 = scale_g(params["whh1"]); bl1 = scale_g(params["bl1"])

    wp1s = params["wp1"][:H]                          # static half of the fused predictor weight
    wp1d = params["wp1"][H:]                          # dynamic half
    wp2p = jnp.pad(params["wp2"], ((0, 0), (0, Op - O)))
    bp2p = jnp.pad(params["bp2"], ((0, Op - O),))

    inputs = [
        static_p, seq_p,
        params["w1"], params["b1"][None, :],
        params["w2"], params["b2"][None, :],
        wih0, bl0[None, :],
        whh0,
        wih1, whh1, bl1[None, :],
        wp1s, wp1d, params["bp1"][None, :],
        wp2p, bp2p[None, :],
    ]

    full_vmem = pl.BlockSpec(memory_space=pltpu.MemorySpace.VMEM)   # weights: grid-invariant
    in_specs = [
        pl.BlockSpec((TILE_B, S), lambda i: (i, 0)),          # static rows of this batch tile
        pl.BlockSpec((T, TILE_B, F), lambda i: (0, i, 0)),    # sequence slab of this batch tile
    ] + [full_vmem] * (len(inputs) - 2)
    out_specs = pl.BlockSpec((TILE_B, Op), lambda i: (i, 0))

    kernel = functools.partial(dynamics_lstm_kernel, T=T, TB=TILE_B, H=H)
    out = pl.pallas_call(
        kernel,
        out_shape=jax.ShapeDtypeStruct((Bp, Op), jnp.float32),
        grid=(Bp // TILE_B,),                                  # batch-parallel (2 TCs on v7x)
        in_specs=in_specs,
        out_specs=out_specs,
        scratch_shapes=[pltpu.VMEM((T * TILE_B, 4 * H), jnp.float32)],
        compiler_params=pltpu.CompilerParams(
            dimension_semantics=("parallel",),
            vmem_limit_bytes=32 * 1024 * 1024),
    )(*inputs)

    return out[:B, :O].reshape(B, output_horizon, output_dim)


def reference_forward(static_input, sequence_input, p, output_horizon, output_dim):
    """Pure-JAX f32 reference matching the PyTorch module semantics."""
    H = p["w1"].shape[1]
    x = jnp.maximum(static_input @ p["w1"] + p["b1"], 0.0)
    static_feat = x @ p["w2"] + p["b2"]

    B, T, _ = sequence_input.shape

    def cell(x_t, h, c, wih, whh, b):
        g = x_t @ wih + h @ whh + b
        i = jax.nn.sigmoid(g[:, :H])
        f = jax.nn.sigmoid(g[:, H:2 * H])
        gg = jnp.tanh(g[:, 2 * H:3 * H])
        o = jax.nn.sigmoid(g[:, 3 * H:])
        c = f * c + i * gg
        h = o * jnp.tanh(c)
        return h, c

    h0 = jnp.zeros((B, H)); c0 = jnp.zeros((B, H))
    h1 = jnp.zeros((B, H)); c1 = jnp.zeros((B, H))
    for t in range(T):
        h0, c0 = cell(sequence_input[:, t], h0, c0, p["wih0"], p["whh0"], p["bl0"])
        h1, c1 = cell(h0, h1, c1, p["wih1"], p["whh1"], p["bl1"])

    fused = jnp.concatenate([static_feat, h1], axis=-1)
    hid = jnp.maximum(fused @ p["wp1"] + p["bp1"], 0.0)
    out = hid @ p["wp2"] + p["bp2"]
    return out.reshape(-1, output_horizon, output_dim)


if __name__ == "__main__":
    # small shapes consistent with the module's forward
    batch = 2
    static_dim = 4
    seq_feature_dim = 8
    seq_len = 8
    hidden_dim = 32
    output_horizon = 4
    output_dim = 3

    key = jax.random.PRNGKey(0)
    k_params, k_static, k_seq = jax.random.split(key, 3)

    params = init_params(k_params, static_dim, seq_feature_dim, hidden_dim,
                         output_horizon, output_dim)
    static_input = jax.random.normal(k_static, (batch, static_dim), jnp.float32)
    sequence_input = jax.random.normal(k_seq, (batch, seq_len, seq_feature_dim), jnp.float32)

    out = dynamics_lstm_forward(static_input, sequence_input, params,
                                output_horizon=output_horizon, output_dim=output_dim)
    out = jax.block_until_ready(out)

    ref = reference_forward(static_input, sequence_input, params, output_horizon, output_dim)
    assert out.shape == (batch, output_horizon, output_dim)
    assert jnp.allclose(out, ref, rtol=1e-4, atol=1e-4)

    print("KERNEL_OK")
</pallas_src>

<mosaic_0001>
module attributes {stable_mosaic.version = 11 : i64} {
  func.func @dynamics_lstm_kernel(%arg0: i32, %arg1: memref<8x4xf32, #tpu.memory_space<vmem>>, %arg2: memref<8x8x8xf32, #tpu.memory_space<vmem>>, %arg3: memref<4x32xf32, #tpu.memory_space<vmem>>, %arg4: memref<1x32xf32, #tpu.memory_space<vmem>>, %arg5: memref<32x32xf32, #tpu.memory_space<vmem>>, %arg6: memref<1x32xf32, #tpu.memory_space<vmem>>, %arg7: memref<8x128xf32, #tpu.memory_space<vmem>>, %arg8: memref<1x128xf32, #tpu.memory_space<vmem>>, %arg9: memref<32x128xf32, #tpu.memory_space<vmem>>, %arg10: memref<32x128xf32, #tpu.memory_space<vmem>>, %arg11: memref<32x128xf32, #tpu.memory_space<vmem>>, %arg12: memref<1x128xf32, #tpu.memory_space<vmem>>, %arg13: memref<32x32xf32, #tpu.memory_space<vmem>>, %arg14: memref<32x32xf32, #tpu.memory_space<vmem>>, %arg15: memref<1x32xf32, #tpu.memory_space<vmem>>, %arg16: memref<32x128xf32, #tpu.memory_space<vmem>>, %arg17: memref<1x128xf32, #tpu.memory_space<vmem>>, %arg18: memref<8x128xf32, #tpu.memory_space<vmem>>, %arg19: memref<64x128xf32, #tpu.memory_space<vmem>>) attributes {dimension_semantics = [#tpu.dimension_semantics<parallel>], iteration_bounds = array<i64: 1>, scalar_prefetch = 0 : i64, scratch_operands = 1 : i64, tpu.core_type = #tpu.core_type<tc>, window_params = [{transform_indices = @transform_0, window_bounds = array<i64: 8, 4>}, {transform_indices = @transform_1, window_bounds = array<i64: 8, 8, 8>}, {pipeline_mode = #tpu.pipeline_mode<synchronous>, transform_indices = @transform_2, window_bounds = array<i64: 4, 32>}, {pipeline_mode = #tpu.pipeline_mode<synchronous>, transform_indices = @transform_3, window_bounds = array<i64: 1, 32>}, {pipeline_mode = #tpu.pipeline_mode<synchronous>, transform_indices = @transform_4, window_bounds = array<i64: 32, 32>}, {pipeline_mode = #tpu.pipeline_mode<synchronous>, transform_indices = @transform_5, window_bounds = array<i64: 1, 32>}, {pipeline_mode = #tpu.pipeline_mode<synchronous>, transform_indices = @transform_6, window_bounds = array<i64: 8, 128>}, {pipeline_mode = #tpu.pipeline_mode<synchronous>, transform_indices = @transform_7, window_bounds = array<i64: 1, 128>}, {pipeline_mode = #tpu.pipeline_mode<synchronous>, transform_indices = @transform_8, window_bounds = array<i64: 32, 128>}, {pipeline_mode = #tpu.pipeline_mode<synchronous>, transform_indices = @transform_9, window_bounds = array<i64: 32, 128>}, {pipeline_mode = #tpu.pipeline_mode<synchronous>, transform_indices = @transform_10, window_bounds = array<i64: 32, 128>}, {pipeline_mode = #tpu.pipeline_mode<synchronous>, transform_indices = @transform_11, window_bounds = array<i64: 1, 128>}, {pipeline_mode = #tpu.pipeline_mode<synchronous>, transform_indices = @transform_12, window_bounds = array<i64: 32, 32>}, {pipeline_mode = #tpu.pipeline_mode<synchronous>, transform_indices = @transform_13, window_bounds = array<i64: 32, 32>}, {pipeline_mode = #tpu.pipeline_mode<synchronous>, transform_indices = @transform_14, window_bounds = array<i64: 1, 32>}, {pipeline_mode = #tpu.pipeline_mode<synchronous>, transform_indices = @transform_15, window_bounds = array<i64: 32, 128>}, {pipeline_mode = #tpu.pipeline_mode<synchronous>, transform_indices = @transform_16, window_bounds = array<i64: 1, 128>}, {transform_indices = @transform_17, window_bounds = array<i64: 8, 128>}]} {
    %c0 = arith.constant 0 : index
    %c0_0 = arith.constant 0 : index
    %0 = vector.load %arg1[%c0, %c0_0] : memref<8x4xf32, #tpu.memory_space<vmem>>, vector<8x4xf32>
    %c0_1 = arith.constant 0 : index
    %c0_2 = arith.constant 0 : index
    %1 = vector.load %arg3[%c0_1, %c0_2] : memref<4x32xf32, #tpu.memory_space<vmem>>, vector<4x32xf32>
    %cst = arith.constant dense<0.000000e+00> : vector<8x32xf32>
    %2 = tpu.matmul %0, %1, %cst {dimension_numbers = #tpu.dot_dimension_numbers<[1], [0], [0], [1], [0, 0, 1, 1], [], []>} : vector<8x4xf32>, vector<4x32xf32>, vector<8x32xf32> -> vector<8x32xf32>
    %c0_3 = arith.constant 0 : index
    %c0_4 = arith.constant 0 : index
    %3 = vector.load %arg4[%c0_3, %c0_4] : memref<1x32xf32, #tpu.memory_space<vmem>>, vector<1x32xf32>
    %4 = vector.broadcast %3 : vector<1x32xf32> to vector<8x32xf32>
    %5 = arith.addf %2, %4 : vector<8x32xf32>
    %cst_5 = arith.constant 0.000000e+00 : f32
    %6 = vector.broadcast %cst_5 : f32 to vector<8x32xf32>
    %7 = arith.maximumf %5, %6 : vector<8x32xf32>
    %c0_6 = arith.constant 0 : index
    %c0_7 = arith.constant 0 : index
    %8 = vector.load %arg5[%c0_6, %c0_7] : memref<32x32xf32, #tpu.memory_space<vmem>>, vector<32x32xf32>
    %cst_8 = arith.constant dense<0.000000e+00> : vector<8x32xf32>
    %9 = tpu.matmul %7, %8, %cst_8 {dimension_numbers = #tpu.dot_dimension_numbers<[1], [0], [0], [1], [0, 0, 1, 1], [], []>} : vector<8x32xf32>, vector<32x32xf32>, vector<8x32xf32> -> vector<8x32xf32>
    %c0_9 = arith.constant 0 : index
    %c0_10 = arith.constant 0 : index
    %10 = vector.load %arg6[%c0_9, %c0_10] : memref<1x32xf32, #tpu.memory_space<vmem>>, vector<1x32xf32>
    %11 = vector.broadcast %10 : vector<1x32xf32> to vector<8x32xf32>
    %12 = arith.addf %9, %11 : vector<8x32xf32>
    %c0_11 = arith.constant 0 : index
    %c0_12 = arith.constant 0 : index
    %c0_13 = arith.constant 0 : index
    %13 = vector.load %arg2[%c0_11, %c0_12, %c0_13] : memref<8x8x8xf32, #tpu.memory_space<vmem>>, vector<8x8x8xf32>
    %14 = vector.shape_cast %13 : vector<8x8x8xf32> to vector<64x8xf32>
    %c0_14 = arith.constant 0 : index
    %c0_15 = arith.constant 0 : index
    %15 = vector.load %arg7[%c0_14, %c0_15] : memref<8x128xf32, #tpu.memory_space<vmem>>, vector<8x128xf32>
    %cst_16 = arith.constant dense<0.000000e+00> : vector<64x128xf32>
    %16 = tpu.matmul %14, %15, %cst_16 {dimension_numbers = #tpu.dot_dimension_numbers<[1], [0], [0], [1], [0, 0, 1, 1], [], []>} : vector<64x8xf32>, vector<8x128xf32>, vector<64x128xf32> -> vector<64x128xf32>
    %c0_17 = arith.constant 0 : index
    %c0_18 = arith.constant 0 : index
    %17 = vector.load %arg8[%c0_17, %c0_18] : memref<1x128xf32, #tpu.memory_space<vmem>>, vector<1x128xf32>
    %18 = vector.broadcast %17 : vector<1x128xf32> to vector<64x128xf32>
    %19 = arith.addf %16, %18 : vector<64x128xf32>
    %c0_19 = arith.constant 0 : index
    %c0_20 = arith.constant 0 : index
    %20 = vector.load %arg19[%c0_19, %c0_20] : memref<64x128xf32, #tpu.memory_space<vmem>>, vector<64x128xf32>
    tpu.vector_store %arg19[%c0_19, %c0_20], %19 {strides = array<i32>} : memref<64x128xf32, #tpu.memory_space<vmem>>, vector<64x128xf32>,
    %c0_21 = arith.constant 0 : index
    %c0_22 = arith.constant 0 : index
    %21 = vector.load %arg12[%c0_21, %c0_22] : memref<1x128xf32, #tpu.memory_space<vmem>>, vector<1x128xf32>
    %22 = vector.shape_cast %21 : vector<1x128xf32> to vector<1x128xf32>
    %23 = vector.broadcast %22 : vector<1x128xf32> to vector<8x128xf32>
    %cst_23 = arith.constant 0.000000e+00 : f32
    %24 = vector.broadcast %cst_23 : f32 to vector<8x32xf32>
    %cst_24 = arith.constant 0.000000e+00 : f32
    %25 = vector.broadcast %cst_24 : f32 to vector<8x32xf32>
    %c0_25 = arith.constant 0 : index
    %c0_26 = arith.constant 0 : index
    %26 = vector.load %arg19[%c0_25, %c0_26] : memref<64x128xf32, #tpu.memory_space<vmem>>, vector<8x128xf32>
    %27 = arith.negf %26 : vector<8x128xf32>
    %28 = math.exp %27 : vector<8x128xf32>
    %cst_27 = arith.constant 1.000000e+00 : f32
    %29 = vector.broadcast %cst_27 : f32 to vector<8x128xf32>
    %30 = arith.addf %29, %28 : vector<8x128xf32>
    %31 = arith.divf %29, %30 : vector<8x128xf32>
    %32 = vector.extract_strided_slice %31 {offsets = [0, 0], sizes = [8, 32], strides = [1, 1]} : vector<8x128xf32> to vector<8x32xf32>
    %33 = vector.extract_strided_slice %31 {offsets = [0, 32], sizes = [8, 32], strides = [1, 1]} : vector<8x128xf32> to vector<8x32xf32>
    %34 = vector.extract_strided_slice %31 {offsets = [0, 64], sizes = [8, 32], strides = [1, 1]} : vector<8x128xf32> to vector<8x32xf32>
    %cst_28 = arith.constant 2.000000e+00 : f32
    %35 = vector.broadcast %cst_28 : f32 to vector<8x32xf32>
    %36 = arith.mulf %35, %34 : vector<8x32xf32>
    %cst_29 = arith.constant 1.000000e+00 : f32
    %37 = vector.broadcast %cst_29 : f32 to vector<8x32xf32>
    %38 = arith.subf %36, %37 : vector<8x32xf32>
    %39 = vector.extract_strided_slice %31 {offsets = [0, 96], sizes = [8, 32], strides = [1, 1]} : vector<8x128xf32> to vector<8x32xf32>
    %40 = arith.mulf %33, %24 : vector<8x32xf32>
    %41 = arith.mulf %32, %38 : vector<8x32xf32>
    %42 = arith.addf %40, %41 : vector<8x32xf32>
    %43 = math.tanh %42 : vector<8x32xf32>
    %44 = arith.mulf %39, %43 : vector<8x32xf32>
    %c8 = arith.constant 8 : index
    %c0_30 = arith.constant 0 : index
    %45 = vector.load %arg19[%c8, %c0_30] : memref<64x128xf32, #tpu.memory_space<vmem>>, vector<8x128xf32>
    %c0_31 = arith.constant 0 : index
    %c0_32 = arith.constant 0 : index
    %46 = vector.load %arg9[%c0_31, %c0_32] : memref<32x128xf32, #tpu.memory_space<vmem>>, vector<32x128xf32>
    %cst_33 = arith.constant dense<0.000000e+00> : vector<8x128xf32>
    %47 = tpu.matmul %44, %46, %cst_33 {dimension_numbers = #tpu.dot_dimension_numbers<[1], [0], [0], [1], [0, 0, 1, 1], [], []>} : vector<8x32xf32>, vector<32x128xf32>, vector<8x128xf32> -> vector<8x128xf32>
    %48 = arith.addf %45, %47 : vector<8x128xf32>
    %c0_34 = arith.constant 0 : index
    %c0_35 = arith.constant 0 : index
    %49 = vector.load %arg10[%c0_34, %c0_35] : memref<32x128xf32, #tpu.memory_space<vmem>>, vector<32x128xf32>
    %cst_36 = arith.constant dense<0.000000e+00> : vector<8x128xf32>
    %50 = tpu.matmul %44, %49, %cst_36 {dimension_numbers = #tpu.dot_dimension_numbers<[1], [0], [0], [1], [0, 0, 1, 1], [], []>} : vector<8x32xf32>, vector<32x128xf32>, vector<8x128xf32> -> vector<8x128xf32>
    %51 = arith.addf %50, %23 : vector<8x128xf32>
    %52 = arith.negf %51 : vector<8x128xf32>
    %53 = math.exp %52 : vector<8x128xf32>
    %cst_37 = arith.constant 1.000000e+00 : f32
    %54 = vector.broadcast %cst_37 : f32 to vector<8x128xf32>
    %55 = arith.addf %54, %53 : vector<8x128xf32>
    %56 = arith.divf %54, %55 : vector<8x128xf32>
    %57 = vector.extract_strided_slice %56 {offsets = [0, 0], sizes = [8, 32], strides = [1, 1]} : vector<8x128xf32> to vector<8x32xf32>
    %58 = vector.extract_strided_slice %56 {offsets = [0, 32], sizes = [8, 32], strides = [1, 1]} : vector<8x128xf32> to vector<8x32xf32>
    %59 = vector.extract_strided_slice %56 {offsets = [0, 64], sizes = [8, 32], strides = [1, 1]} : vector<8x128xf32> to vector<8x32xf32>
    %cst_38 = arith.constant 2.000000e+00 : f32
    %60 = vector.broadcast %cst_38 : f32 to vector<8x32xf32>
    %61 = arith.mulf %60, %59 : vector<8x32xf32>
    %cst_39 = arith.constant 1.000000e+00 : f32
    %62 = vector.broadcast %cst_39 : f32 to vector<8x32xf32>
    %63 = arith.subf %61, %62 : vector<8x32xf32>
    %64 = vector.extract_strided_slice %56 {offsets = [0, 96], sizes = [8, 32], strides = [1, 1]} : vector<8x128xf32> to vector<8x32xf32>
    %65 = arith.mulf %58, %25 : vector<8x32xf32>
    %66 = arith.mulf %57, %63 : vector<8x32xf32>
    %67 = arith.addf %65, %66 : vector<8x32xf32>
    %68 = math.tanh %67 : vector<8x32xf32>
    %69 = arith.mulf %64, %68 : vector<8x32xf32>
    %70 = arith.negf %48 : vector<8x128xf32>
    %71 = math.exp %70 : vector<8x128xf32>
    %cst_40 = arith.constant 1.000000e+00 : f32
    %72 = vector.broadcast %cst_40 : f32 to vector<8x128xf32>
    %73 = arith.addf %72, %71 : vector<8x128xf32>
    %74 = arith.divf %72, %73 : vector<8x128xf32>
    %75 = vector.extract_strided_slice %74 {offsets = [0, 0], sizes = [8, 32], strides = [1, 1]} : vector<8x128xf32> to vector<8x32xf32>
    %76 = vector.extract_strided_slice %74 {offsets = [0, 32], sizes = [8, 32], strides = [1, 1]} : vector<8x128xf32> to vector<8x32xf32>
    %77 = vector.extract_strided_slice %74 {offsets = [0, 64], sizes = [8, 32], strides = [1, 1]} : vector<8x128xf32> to vector<8x32xf32>
    %cst_41 = arith.constant 2.000000e+00 : f32
    %78 = vector.broadcast %cst_41 : f32 to vector<8x32xf32>
    %79 = arith.mulf %78, %77 : vector<8x32xf32>
    %cst_42 = arith.constant 1.000000e+00 : f32
    %80 = vector.broadcast %cst_42 : f32 to vector<8x32xf32>
    %81 = arith.subf %79, %80 : vector<8x32xf32>
    %82 = vector.extract_strided_slice %74 {offsets = [0, 96], sizes = [8, 32], strides = [1, 1]} : vector<8x128xf32> to vector<8x32xf32>
    %83 = arith.mulf %76, %42 : vector<8x32xf32>
    %84 = arith.mulf %75, %81 : vector<8x32xf32>
    %85 = arith.addf %83, %84 : vector<8x32xf32>
    %86 = math.tanh %85 : vector<8x32xf32>
    %87 = arith.mulf %82, %86 : vector<8x32xf32>
    %c16 = arith.constant 16 : index
    %c0_43 = arith.constant 0 : index
    %88 = vector.load %arg19[%c16, %c0_43] : memref<64x128xf32, #tpu.memory_space<vmem>>, vector<8x128xf32>
    %c0_44 = arith.constant 0 : index
    %c0_45 = arith.constant 0 : index
    %89 = vector.load %arg9[%c0_44, %c0_45] : memref<32x128xf32, #tpu.memory_space<vmem>>, vector<32x128xf32>
    %cst_46 = arith.constant dense<0.000000e+00> : vector<8x128xf32>
    %90 = tpu.matmul %87, %89, %cst_46 {dimension_numbers = #tpu.dot_dimension_numbers<[1], [0], [0], [1], [0, 0, 1, 1], [], []>} : vector<8x32xf32>, vector<32x128xf32>, vector<8x128xf32> -> vector<8x128xf32>
    %91 = arith.addf %88, %90 : vector<8x128xf32>
    %c0_47 = arith.constant 0 : index
    %c0_48 = arith.constant 0 : index
    %92 = vector.load %arg10[%c0_47, %c0_48] : memref<32x128xf32, #tpu.memory_space<vmem>>, vector<32x128xf32>
    %cst_49 = arith.constant dense<0.000000e+00> : vector<8x128xf32>
    %93 = tpu.matmul %87, %92, %cst_49 {dimension_numbers = #tpu.dot_dimension_numbers<[1], [0], [0], [1], [0, 0, 1, 1], [], []>} : vector<8x32xf32>, vector<32x128xf32>, vector<8x128xf32> -> vector<8x128xf32>
    %c0_50 = arith.constant 0 : index
    %c0_51 = arith.constant 0 : index
    %94 = vector.load %arg11[%c0_50, %c0_51] : memref<32x128xf32, #tpu.memory_space<vmem>>, vector<32x128xf32>
    %cst_52 = arith.constant dense<0.000000e+00> : vector<8x128xf32>
    %95 = tpu.matmul %69, %94, %cst_52 {dimension_numbers = #tpu.dot_dimension_numbers<[1], [0], [0], [1], [0, 0, 1, 1], [], []>} : vector<8x32xf32>, vector<32x128xf32>, vector<8x128xf32> -> vector<8x128xf32>
    %96 = arith.addf %93, %95 : vector<8x128xf32>
    %97 = arith.addf %96, %23 : vector<8x128xf32>
    %98 = arith.negf %97 : vector<8x128xf32>
    %99 = math.exp %98 : vector<8x128xf32>
    %cst_53 = arith.constant 1.000000e+00 : f32
    %100 = vector.broadcast %cst_53 : f32 to vector<8x128xf32>
    %101 = arith.addf %100, %99 : vector<8x128xf32>
    %102 = arith.divf %100, %101 : vector<8x128xf32>
    %103 = vector.extract_strided_slice %102 {offsets = [0, 0], sizes = [8, 32], strides = [1, 1]} : vector<8x128xf32> to vector<8x32xf32>
    %104 = vector.extract_strided_slice %102 {offsets = [0, 32], sizes = [8, 32], strides = [1, 1]} : vector<8x128xf32> to vector<8x32xf32>
    %105 = vector.extract_strided_slice %102 {offsets = [0, 64], sizes = [8, 32], strides = [1, 1]} : vector<8x128xf32> to vector<8x32xf32>
    %cst_54 = arith.constant 2.000000e+00 : f32
    %106 = vector.broadcast %cst_54 : f32 to vector<8x32xf32>
    %107 = arith.mulf %106, %105 : vector<8x32xf32>
    %cst_55 = arith.constant 1.000000e+00 : f32
    %108 = vector.broadcast %cst_55 : f32 to vector<8x32xf32>
    %109 = arith.subf %107, %108 : vector<8x32xf32>
    %110 = vector.extract_strided_slice %102 {offsets = [0, 96], sizes = [8, 32], strides = [1, 1]} : vector<8x128xf32> to vector<8x32xf32>
    %111 = arith.mulf %104, %67 : vector<8x32xf32>
    %112 = arith.mulf %103, %109 : vector<8x32xf32>
    %113 = arith.addf %111, %112 : vector<8x32xf32>
    %114 = math.tanh %113 : vector<8x32xf32>
    %115 = arith.mulf %110, %114 : vector<8x32xf32>
    %116 = arith.negf %91 : vector<8x128xf32>
    %117 = math.exp %116 : vector<8x128xf32>
    %cst_56 = arith.constant 1.000000e+00 : f32
    %118 = vector.broadcast %cst_56 : f32 to vector<8x128xf32>
    %119 = arith.addf %118, %117 : vector<8x128xf32>
    %120 = arith.divf %118, %119 : vector<8x128xf32>
    %121 = vector.extract_strided_slice %120 {offsets = [0, 0], sizes = [8, 32], strides = [1, 1]} : vector<8x128xf32> to vector<8x32xf32>
    %122 = vector.extract_strided_slice %120 {offsets = [0, 32], sizes = [8, 32], strides = [1, 1]} : vector<8x128xf32> to vector<8x32xf32>
    %123 = vector.extract_strided_slice %120 {offsets = [0, 64], sizes = [8, 32], strides = [1, 1]} : vector<8x128xf32> to vector<8x32xf32>
    %cst_57 = arith.constant 2.000000e+00 : f32
    %124 = vector.broadcast %cst_57 : f32 to vector<8x32xf32>
    %125 = arith.mulf %124, %123 : vector<8x32xf32>
    %cst_58 = arith.constant 1.000000e+00 : f32
    %126 = vector.broadcast %cst_58 : f32 to vector<8x32xf32>
    %127 = arith.subf %125, %126 : vector<8x32xf32>
    %128 = vector.extract_strided_slice %120 {offsets = [0, 96], sizes = [8, 32], strides = [1, 1]} : vector<8x128xf32> to vector<8x32xf32>
    %129 = arith.mulf %122, %85 : vector<8x32xf32>
    %130 = arith.mulf %121, %127 : vector<8x32xf32>
    %131 = arith.addf %129, %130 : vector<8x32xf32>
    %132 = math.tanh %131 : vector<8x32xf32>
    %133 = arith.mulf %128, %132 : vector<8x32xf32>
    %c24 = arith.constant 24 : index
    %c0_59 = arith.constant 0 : index
    %134 = vector.load %arg19[%c24, %c0_59] : memref<64x128xf32, #tpu.memory_space<vmem>>, vector<8x128xf32>
    %c0_60 = arith.constant 0 : index
    %c0_61 = arith.constant 0 : index
    %135 = vector.load %arg9[%c0_60, %c0_61] : memref<32x128xf32, #tpu.memory_space<vmem>>, vector<32x128xf32>
    %cst_62 = arith.constant dense<0.000000e+00> : vector<8x128xf32>
    %136 = tpu.matmul %133, %135, %cst_62 {dimension_numbers = #tpu.dot_dimension_numbers<[1], [0], [0], [1], [0, 0, 1, 1], [], []>} : vector<8x32xf32>, vector<32x128xf32>, vector<8x128xf32> -> vector<8x128xf32>
    %137 = arith.addf %134, %136 : vector<8x128xf32>
    %c0_63 = arith.constant 0 : index
    %c0_64 = arith.constant 0 : index
    %138 = vector.load %arg10[%c0_63, %c0_64] : memref<32x128xf32, #tpu.memory_space<vmem>>, vector<32x128xf32>
    %cst_65 = arith.constant dense<0.000000e+00> : vector<8x128xf32>
    %139 = tpu.matmul %133, %138, %cst_65 {dimension_numbers = #tpu.dot_dimension_numbers<[1], [0], [0], [1], [0, 0, 1, 1], [], []>} : vector<8x32xf32>, vector<32x128xf32>, vector<8x128xf32> -> vector<8x128xf32>
    %c0_66 = arith.constant 0 : index
    %c0_67 = arith.constant 0 : index
    %140 = vector.load %arg11[%c0_66, %c0_67] : memref<32x128xf32, #tpu.memory_space<vmem>>, vector<32x128xf32>
    %cst_68 = arith.constant dense<0.000000e+00> : vector<8x128xf32>
    %141 = tpu.matmul %115, %140, %cst_68 {dimension_numbers = #tpu.dot_dimension_numbers<[1], [0], [0], [1], [0, 0, 1, 1], [], []>} : vector<8x32xf32>, vector<32x128xf32>, vector<8x128xf32> -> vector<8x128xf32>
    %142 = arith.addf %139, %141 : vector<8x128xf32>
    %143 = arith.addf %142, %23 : vector<8x128xf32>
    %144 = arith.negf %143 : vector<8x128xf32>
    %145 = math.exp %144 : vector<8x128xf32>
    %cst_69 = arith.constant 1.000000e+00 : f32
    %146 = vector.broadcast %cst_69 : f32 to vector<8x128xf32>
    %147 = arith.addf %146, %145 : vector<8x128xf32>
    %148 = arith.divf %146, %147 : vector<8x128xf32>
    %149 = vector.extract_strided_slice %148 {offsets = [0, 0], sizes = [8, 32], strides = [1, 1]} : vector<8x128xf32> to vector<8x32xf32>
    %150 = vector.extract_strided_slice %148 {offsets = [0, 32], sizes = [8, 32], strides = [1, 1]} : vector<8x128xf32> to vector<8x32xf32>
    %151 = vector.extract_strided_slice %148 {offsets = [0, 64], sizes = [8, 32], strides = [1, 1]} : vector<8x128xf32> to vector<8x32xf32>
    %cst_70 = arith.constant 2.000000e+00 : f32
    %152 = vector.broadcast %cst_70 : f32 to vector<8x32xf32>
    %153 = arith.mulf %152, %151 : vector<8x32xf32>
    %cst_71 = arith.constant 1.000000e+00 : f32
    %154 = vector.broadcast %cst_71 : f32 to vector<8x32xf32>
    %155 = arith.subf %153, %154 : vector<8x32xf32>
    %156 = vector.extract_strided_slice %148 {offsets = [0, 96], sizes = [8, 32], strides = [1, 1]} : vector<8x128xf32> to vector<8x32xf32>
    %157 = arith.mulf %150, %113 : vector<8x32xf32>
    %158 = arith.mulf %149, %155 : vector<8x32xf32>
    %159 = arith.addf %157, %158 : vector<8x32xf32>
    %160 = math.tanh %159 : vector<8x32xf32>
    %161 = arith.mulf %156, %160 : vector<8x32xf32>
    %162 = arith.negf %137 : vector<8x128xf32>
    %163 = math.exp %162 : vector<8x128xf32>
    %cst_72 = arith.constant 1.000000e+00 : f32
    %164 = vector.broadcast %cst_72 : f32 to vector<8x128xf32>
    %165 = arith.addf %164, %163 : vector<8x128xf32>
    %166 = arith.divf %164, %165 : vector<8x128xf32>
    %167 = vector.extract_strided_slice %166 {offsets = [0, 0], sizes = [8, 32], strides = [1, 1]} : vector<8x128xf32> to vector<8x32xf32>
    %168 = vector.extract_strided_slice %166 {offsets = [0, 32], sizes = [8, 32], strides = [1, 1]} : vector<8x128xf32> to vector<8x32xf32>
    %169 = vector.extract_strided_slice %166 {offsets = [0, 64], sizes = [8, 32], strides = [1, 1]} : vector<8x128xf32> to vector<8x32xf32>
    %cst_73 = arith.constant 2.000000e+00 : f32
    %170 = vector.broadcast %cst_73 : f32 to vector<8x32xf32>
    %171 = arith.mulf %170, %169 : vector<8x32xf32>
    %cst_74 = arith.constant 1.000000e+00 : f32
    %172 = vector.broadcast %cst_74 : f32 to vector<8x32xf32>
    %173 = arith.subf %171, %172 : vector<8x32xf32>
    %174 = vector.extract_strided_slice %166 {offsets = [0, 96], sizes = [8, 32], strides = [1, 1]} : vector<8x128xf32> to vector<8x32xf32>
    %175 = arith.mulf %168, %131 : vector<8x32xf32>
    %176 = arith.mulf %167, %173 : vector<8x32xf32>
    %177 = arith.addf %175, %176 : vector<8x32xf32>
    %178 = math.tanh %177 : vector<8x32xf32>
    %179 = arith.mulf %174, %178 : vector<8x32xf32>
    %c32 = arith.constant 32 : index
    %c0_75 = arith.constant 0 : index
    %180 = vector.load %arg19[%c32, %c0_75] : memref<64x128xf32, #tpu.memory_space<vmem>>, vector<8x128xf32>
    %c0_76 = arith.constant 0 : index
    %c0_77 = arith.constant 0 : index
    %181 = vector.load %arg9[%c0_76, %c0_77] : memref<32x128xf32, #tpu.memory_space<vmem>>, vector<32x128xf32>
    %cst_78 = arith.constant dense<0.000000e+00> : vector<8x128xf32>
    %182 = tpu.matmul %179, %181, %cst_78 {dimension_numbers = #tpu.dot_dimension_numbers<[1], [0], [0], [1], [0, 0, 1, 1], [], []>} : vector<8x32xf32>, vector<32x128xf32>, vector<8x128xf32> -> vector<8x128xf32>
    %183 = arith.addf %180, %182 : vector<8x128xf32>
    %c0_79 = arith.constant 0 : index
    %c0_80 = arith.constant 0 : index
    %184 = vector.load %arg10[%c0_79, %c0_80] : memref<32x128xf32, #tpu.memory_space<vmem>>, vector<32x128xf32>
    %cst_81 = arith.constant dense<0.000000e+00> : vector<8x128xf32>
    %185 = tpu.matmul %179, %184, %cst_81 {dimension_numbers = #tpu.dot_dimension_numbers<[1], [0], [0], [1], [0, 0, 1, 1], [], []>} : vector<8x32xf32>, vector<32x128xf32>, vector<8x128xf32> -> vector<8x128xf32>
    %c0_82 = arith.constant 0 : index
    %c0_83 = arith.constant 0 : index
    %186 = vector.load %arg11[%c0_82, %c0_83] : memref<32x128xf32, #tpu.memory_space<vmem>>, vector<32x128xf32>
    %cst_84 = arith.constant dense<0.000000e+00> : vector<8x128xf32>
    %187 = tpu.matmul %161, %186, %cst_84 {dimension_numbers = #tpu.dot_dimension_numbers<[1], [0], [0], [1], [0, 0, 1, 1], [], []>} : vector<8x32xf32>, vector<32x128xf32>, vector<8x128xf32> -> vector<8x128xf32>
    %188 = arith.addf %185, %187 : vector<8x128xf32>
    %189 = arith.addf %188, %23 : vector<8x128xf32>
    %190 = arith.negf %189 : vector<8x128xf32>
    %191 = math.exp %190 : vector<8x128xf32>
    %cst_85 = arith.constant 1.000000e+00 : f32
    %192 = vector.broadcast %cst_85 : f32 to vector<8x128xf32>
    %193 = arith.addf %192, %191 : vector<8x128xf32>
    %194 = arith.divf %192, %193 : vector<8x128xf32>
    %195 = vector.extract_strided_slice %194 {offsets = [0, 0], sizes = [8, 32], strides = [1, 1]} : vector<8x128xf32> to vector<8x32xf32>
    %196 = vector.extract_strided_slice %194 {offsets = [0, 32], sizes = [8, 32], strides = [1, 1]} : vector<8x128xf32> to vector<8x32xf32>
    %197 = vector.extract_strided_slice %194 {offsets = [0, 64], sizes = [8, 32], strides = [1, 1]} : vector<8x128xf32> to vector<8x32xf32>
    %cst_86 = arith.constant 2.000000e+00 : f32
    %198 = vector.broadcast %cst_86 : f32 to vector<8x32xf32>
    %199 = arith.mulf %198, %197 : vector<8x32xf32>
    %cst_87 = arith.constant 1.000000e+00 : f32
    %200 = vector.broadcast %cst_87 : f32 to vector<8x32xf32>
    %201 = arith.subf %199, %200 : vector<8x32xf32>
    %202 = vector.extract_strided_slice %194 {offsets = [0, 96], sizes = [8, 32], strides = [1, 1]} : vector<8x128xf32> to vector<8x32xf32>
    %203 = arith.mulf %196, %159 : vector<8x32xf32>
    %204 = arith.mulf %195, %201 : vector<8x32xf32>
    %205 = arith.addf %203, %204 : vector<8x32xf32>
    %206 = math.tanh %205 : vector<8x32xf32>
    %207 = arith.mulf %202, %206 : vector<8x32xf32>
    %208 = arith.negf %183 : vector<8x128xf32>
    %209 = math.exp %208 : vector<8x128xf32>
    %cst_88 = arith.constant 1.000000e+00 : f32
    %210 = vector.broadcast %cst_88 : f32 to vector<8x128xf32>
    %211 = arith.addf %210, %209 : vector<8x128xf32>
    %212 = arith.divf %210, %211 : vector<8x128xf32>
    %213 = vector.extract_strided_slice %212 {offsets = [0, 0], sizes = [8, 32], strides = [1, 1]} : vector<8x128xf32> to vector<8x32xf32>
    %214 = vector.extract_strided_slice %212 {offsets = [0, 32], sizes = [8, 32], strides = [1, 1]} : vector<8x128xf32> to vector<8x32xf32>
    %215 = vector.extract_strided_slice %212 {offsets = [0, 64], sizes = [8, 32], strides = [1, 1]} : vector<8x128xf32> to vector<8x32xf32>
    %cst_89 = arith.constant 2.000000e+00 : f32
    %216 = vector.broadcast %cst_89 : f32 to vector<8x32xf32>
    %217 = arith.mulf %216, %215 : vector<8x32xf32>
    %cst_90 = arith.constant 1.000000e+00 : f32
    %218 = vector.broadcast %cst_90 : f32 to vector<8x32xf32>
    %219 = arith.subf %217, %218 : vector<8x32xf32>
    %220 = vector.extract_strided_slice %212 {offsets = [0, 96], sizes = [8, 32], strides = [1, 1]} : vector<8x128xf32> to vector<8x32xf32>
    %221 = arith.mulf %214, %177 : vector<8x32xf32>
    %222 = arith.mulf %213, %219 : vector<8x32xf32>
    %223 = arith.addf %221, %222 : vector<8x32xf32>
    %224 = math.tanh %223 : vector<8x32xf32>
    %225 = arith.mulf %220, %224 : vector<8x32xf32>
    %c40 = arith.constant 40 : index
    %c0_91 = arith.constant 0 : index
    %226 = vector.load %arg19[%c40, %c0_91] : memref<64x128xf32, #tpu.memory_space<vmem>>, vector<8x128xf32>
    %c0_92 = arith.constant 0 : index
    %c0_93 = arith.constant 0 : index
    %227 = vector.load %arg9[%c0_92, %c0_93] : memref<32x128xf32, #tpu.memory_space<vmem>>, vector<32x128xf32>
    %cst_94 = arith.constant dense<0.000000e+00> : vector<8x128xf32>
    %228 = tpu.matmul %225, %227, %cst_94 {dimension_numbers = #tpu.dot_dimension_numbers<[1], [0], [0], [1], [0, 0, 1, 1], [], []>} : vector<8x32xf32>, vector<32x128xf32>, vector<8x128xf32> -> vector<8x128xf32>
    %229 = arith.addf %226, %228 : vector<8x128xf32>
    %c0_95 = arith.constant 0 : index
    %c0_96 = arith.constant 0 : index
    %230 = vector.load %arg10[%c0_95, %c0_96] : memref<32x128xf32, #tpu.memory_space<vmem>>, vector<32x128xf32>
    %cst_97 = arith.constant dense<0.000000e+00> : vector<8x128xf32>
    %231 = tpu.matmul %225, %230, %cst_97 {dimension_numbers = #tpu.dot_dimension_numbers<[1], [0], [0], [1], [0, 0, 1, 1], [], []>} : vector<8x32xf32>, vector<32x128xf32>, vector<8x128xf32> -> vector<8x128xf32>
    %c0_98 = arith.constant 0 : index
    %c0_99 = arith.constant 0 : index
    %232 = vector.load %arg11[%c0_98, %c0_99] : memref<32x128xf32, #tpu.memory_space<vmem>>, vector<32x128xf32>
    %cst_100 = arith.constant dense<0.000000e+00> : vector<8x128xf32>
    %233 = tpu.matmul %207, %232, %cst_100 {dimension_numbers = #tpu.dot_dimension_numbers<[1], [0], [0], [1], [0, 0, 1, 1], [], []>} : vector<8x32xf32>, vector<32x128xf32>, vector<8x128xf32> -> vector<8x128xf32>
    %234 = arith.addf %231, %233 : vector<8x128xf32>
    %235 = arith.addf %234, %23 : vector<8x128xf32>
    %236 = arith.negf %235 : vector<8x128xf32>
    %237 = math.exp %236 : vector<8x128xf32>
    %cst_101 = arith.constant 1.000000e+00 : f32
    %238 = vector.broadcast %cst_101 : f32 to vector<8x128xf32>
    %239 = arith.addf %238, %237 : vector<8x128xf32>
    %240 = arith.divf %238, %239 : vector<8x128xf32>
    %241 = vector.extract_strided_slice %240 {offsets = [0, 0], sizes = [8, 32], strides = [1, 1]} : vector<8x128xf32> to vector<8x32xf32>
    %242 = vector.extract_strided_slice %240 {offsets = [0, 32], sizes = [8, 32], strides = [1, 1]} : vector<8x128xf32> to vector<8x32xf32>
    %243 = vector.extract_strided_slice %240 {offsets = [0, 64], sizes = [8, 32], strides = [1, 1]} : vector<8x128xf32> to vector<8x32xf32>
    %cst_102 = arith.constant 2.000000e+00 : f32
    %244 = vector.broadcast %cst_102 : f32 to vector<8x32xf32>
    %245 = arith.mulf %244, %243 : vector<8x32xf32>
    %cst_103 = arith.constant 1.000000e+00 : f32
    %246 = vector.broadcast %cst_103 : f32 to vector<8x32xf32>
    %247 = arith.subf %245, %246 : vector<8x32xf32>
    %248 = vector.extract_strided_slice %240 {offsets = [0, 96], sizes = [8, 32], strides = [1, 1]} : vector<8x128xf32> to vector<8x32xf32>
    %249 = arith.mulf %242, %205 : vector<8x32xf32>
    %250 = arith.mulf %241, %247 : vector<8x32xf32>
    %251 = arith.addf %249, %250 : vector<8x32xf32>
    %252 = math.tanh %251 : vector<8x32xf32>
    %253 = arith.mulf %248, %252 : vector<8x32xf32>
    %254 = arith.negf %229 : vector<8x128xf32>
    %255 = math.exp %254 : vector<8x128xf32>
    %cst_104 = arith.constant 1.000000e+00 : f32
    %256 = vector.broadcast %cst_104 : f32 to vector<8x128xf32>
    %257 = arith.addf %256, %255 : vector<8x128xf32>
    %258 = arith.divf %256, %257 : vector<8x128xf32>
    %259 = vector.extract_strided_slice %258 {offsets = [0, 0], sizes = [8, 32], strides = [1, 1]} : vector<8x128xf32> to vector<8x32xf32>
    %260 = vector.extract_strided_slice %258 {offsets = [0, 32], sizes = [8, 32], strides = [1, 1]} : vector<8x128xf32> to vector<8x32xf32>
    %261 = vector.extract_strided_slice %258 {offsets = [0, 64], sizes = [8, 32], strides = [1, 1]} : vector<8x128xf32> to vector<8x32xf32>
    %cst_105 = arith.constant 2.000000e+00 : f32
    %262 = vector.broadcast %cst_105 : f32 to vector<8x32xf32>
    %263 = arith.mulf %262, %261 : vector<8x32xf32>
    %cst_106 = arith.constant 1.000000e+00 : f32
    %264 = vector.broadcast %cst_106 : f32 to vector<8x32xf32>
    %265 = arith.subf %263, %264 : vector<8x32xf32>
    %266 = vector.extract_strided_slice %258 {offsets = [0, 96], sizes = [8, 32], strides = [1, 1]} : vector<8x128xf32> to vector<8x32xf32>
    %267 = arith.mulf %260, %223 : vector<8x32xf32>
    %268 = arith.mulf %259, %265 : vector<8x32xf32>
    %269 = arith.addf %267, %268 : vector<8x32xf32>
    %270 = math.tanh %269 : vector<8x32xf32>
    %271 = arith.mulf %266, %270 : vector<8x32xf32>
    %c48 = arith.constant 48 : index
    %c0_107 = arith.constant 0 : index
    %272 = vector.load %arg19[%c48, %c0_107] : memref<64x128xf32, #tpu.memory_space<vmem>>, vector<8x128xf32>
    %c0_108 = arith.constant 0 : index
    %c0_109 = arith.constant 0 : index
    %273 = vector.load %arg9[%c0_108, %c0_109] : memref<32x128xf32, #tpu.memory_space<vmem>>, vector<32x128xf32>
    %cst_110 = arith.constant dense<0.000000e+00> : vector<8x128xf32>
    %274 = tpu.matmul %271, %273, %cst_110 {dimension_numbers = #tpu.dot_dimension_numbers<[1], [0], [0], [1], [0, 0, 1, 1], [], []>} : vector<8x32xf32>, vector<32x128xf32>, vector<8x128xf32> -> vector<8x128xf32>
    %275 = arith.addf %272, %274 : vector<8x128xf32>
    %c0_111 = arith.constant 0 : index
    %c0_112 = arith.constant 0 : index
    %276 = vector.load %arg10[%c0_111, %c0_112] : memref<32x128xf32, #tpu.memory_space<vmem>>, vector<32x128xf32>
    %cst_113 = arith.constant dense<0.000000e+00> : vector<8x128xf32>
    %277 = tpu.matmul %271, %276, %cst_113 {dimension_numbers = #tpu.dot_dimension_numbers<[1], [0], [0], [1], [0, 0, 1, 1], [], []>} : vector<8x32xf32>, vector<32x128xf32>, vector<8x128xf32> -> vector<8x128xf32>
    %c0_114 = arith.constant 0 : index
    %c0_115 = arith.constant 0 : index
    %278 = vector.load %arg11[%c0_114, %c0_115] : memref<32x128xf32, #tpu.memory_space<vmem>>, vector<32x128xf32>
    %cst_116 = arith.constant dense<0.000000e+00> : vector<8x128xf32>
    %279 = tpu.matmul %253, %278, %cst_116 {dimension_numbers = #tpu.dot_dimension_numbers<[1], [0], [0], [1], [0, 0, 1, 1], [], []>} : vector<8x32xf32>, vector<32x128xf32>, vector<8x128xf32> -> vector<8x128xf32>
    %280 = arith.addf %277, %279 : vector<8x128xf32>
    %281 = arith.addf %280, %23 : vector<8x128xf32>
    %282 = arith.negf %281 : vector<8x128xf32>
    %283 = math.exp %282 : vector<8x128xf32>
    %cst_117 = arith.constant 1.000000e+00 : f32
    %284 = vector.broadcast %cst_117 : f32 to vector<8x128xf32>
    %285 = arith.addf %284, %283 : vector<8x128xf32>
    %286 = arith.divf %284, %285 : vector<8x128xf32>
    %287 = vector.extract_strided_slice %286 {offsets = [0, 0], sizes = [8, 32], strides = [1, 1]} : vector<8x128xf32> to vector<8x32xf32>
    %288 = vector.extract_strided_slice %286 {offsets = [0, 32], sizes = [8, 32], strides = [1, 1]} : vector<8x128xf32> to vector<8x32xf32>
    %289 = vector.extract_strided_slice %286 {offsets = [0, 64], sizes = [8, 32], strides = [1, 1]} : vector<8x128xf32> to vector<8x32xf32>
    %cst_118 = arith.constant 2.000000e+00 : f32
    %290 = vector.broadcast %cst_118 : f32 to vector<8x32xf32>
    %291 = arith.mulf %290, %289 : vector<8x32xf32>
    %cst_119 = arith.constant 1.000000e+00 : f32
    %292 = vector.broadcast %cst_119 : f32 to vector<8x32xf32>
    %293 = arith.subf %291, %292 : vector<8x32xf32>
    %294 = vector.extract_strided_slice %286 {offsets = [0, 96], sizes = [8, 32], strides = [1, 1]} : vector<8x128xf32> to vector<8x32xf32>
    %295 = arith.mulf %288, %251 : vector<8x32xf32>
    %296 = arith.mulf %287, %293 : vector<8x32xf32>
    %297 = arith.addf %295, %296 : vector<8x32xf32>
    %298 = math.tanh %297 : vector<8x32xf32>
    %299 = arith.mulf %294, %298 : vector<8x32xf32>
    %300 = arith.negf %275 : vector<8x128xf32>
    %301 = math.exp %300 : vector<8x128xf32>
    %cst_120 = arith.constant 1.000000e+00 : f32
    %302 = vector.broadcast %cst_120 : f32 to vector<8x128xf32>
    %303 = arith.addf %302, %301 : vector<8x128xf32>
    %304 = arith.divf %302, %303 : vector<8x128xf32>
    %305 = vector.extract_strided_slice %304 {offsets = [0, 0], sizes = [8, 32], strides = [1, 1]} : vector<8x128xf32> to vector<8x32xf32>
    %306 = vector.extract_strided_slice %304 {offsets = [0, 32], sizes = [8, 32], strides = [1, 1]} : vector<8x128xf32> to vector<8x32xf32>
    %307 = vector.extract_strided_slice %304 {offsets = [0, 64], sizes = [8, 32], strides = [1, 1]} : vector<8x128xf32> to vector<8x32xf32>
    %cst_121 = arith.constant 2.000000e+00 : f32
    %308 = vector.broadcast %cst_121 : f32 to vector<8x32xf32>
    %309 = arith.mulf %308, %307 : vector<8x32xf32>
    %cst_122 = arith.constant 1.000000e+00 : f32
    %310 = vector.broadcast %cst_122 : f32 to vector<8x32xf32>
    %311 = arith.subf %309, %310 : vector<8x32xf32>
    %312 = vector.extract_strided_slice %304 {offsets = [0, 96], sizes = [8, 32], strides = [1, 1]} : vector<8x128xf32> to vector<8x32xf32>
    %313 = arith.mulf %306, %269 : vector<8x32xf32>
    %314 = arith.mulf %305, %311 : vector<8x32xf32>
    %315 = arith.addf %313, %314 : vector<8x32xf32>
    %316 = math.tanh %315 : vector<8x32xf32>
    %317 = arith.mulf %312, %316 : vector<8x32xf32>
    %c56 = arith.constant 56 : index
    %c0_123 = arith.constant 0 : index
    %318 = vector.load %arg19[%c56, %c0_123] : memref<64x128xf32, #tpu.memory_space<vmem>>, vector<8x128xf32>
    %c0_124 = arith.constant 0 : index
    %c0_125 = arith.constant 0 : index
    %319 = vector.load %arg9[%c0_124, %c0_125] : memref<32x128xf32, #tpu.memory_space<vmem>>, vector<32x128xf32>
    %cst_126 = arith.constant dense<0.000000e+00> : vector<8x128xf32>
    %320 = tpu.matmul %317, %319, %cst_126 {dimension_numbers = #tpu.dot_dimension_numbers<[1], [0], [0], [1], [0, 0, 1, 1], [], []>} : vector<8x32xf32>, vector<32x128xf32>, vector<8x128xf32> -> vector<8x128xf32>
    %321 = arith.addf %318, %320 : vector<8x128xf32>
    %c0_127 = arith.constant 0 : index
    %c0_128 = arith.constant 0 : index
    %322 = vector.load %arg10[%c0_127, %c0_128] : memref<32x128xf32, #tpu.memory_space<vmem>>, vector<32x128xf32>
    %cst_129 = arith.constant dense<0.000000e+00> : vector<8x128xf32>
    %323 = tpu.matmul %317, %322, %cst_129 {dimension_numbers = #tpu.dot_dimension_numbers<[1], [0], [0], [1], [0, 0, 1, 1], [], []>} : vector<8x32xf32>, vector<32x128xf32>, vector<8x128xf32> -> vector<8x128xf32>
    %c0_130 = arith.constant 0 : index
    %c0_131 = arith.constant 0 : index
    %324 = vector.load %arg11[%c0_130, %c0_131] : memref<32x128xf32, #tpu.memory_space<vmem>>, vector<32x128xf32>
    %cst_132 = arith.constant dense<0.000000e+00> : vector<8x128xf32>
    %325 = tpu.matmul %299, %324, %cst_132 {dimension_numbers = #tpu.dot_dimension_numbers<[1], [0], [0], [1], [0, 0, 1, 1], [], []>} : vector<8x32xf32>, vector<32x128xf32>, vector<8x128xf32> -> vector<8x128xf32>
    %326 = arith.addf %323, %325 : vector<8x128xf32>
    %327 = arith.addf %326, %23 : vector<8x128xf32>
    %328 = arith.negf %327 : vector<8x128xf32>
    %329 = math.exp %328 : vector<8x128xf32>
    %cst_133 = arith.constant 1.000000e+00 : f32
    %330 = vector.broadcast %cst_133 : f32 to vector<8x128xf32>
    %331 = arith.addf %330, %329 : vector<8x128xf32>
    %332 = arith.divf %330, %331 : vector<8x128xf32>
    %333 = vector.extract_strided_slice %332 {offsets = [0, 0], sizes = [8, 32], strides = [1, 1]} : vector<8x128xf32> to vector<8x32xf32>
    %334 = vector.extract_strided_slice %332 {offsets = [0, 32], sizes = [8, 32], strides = [1, 1]} : vector<8x128xf32> to vector<8x32xf32>
    %335 = vector.extract_strided_slice %332 {offsets = [0, 64], sizes = [8, 32], strides = [1, 1]} : vector<8x128xf32> to vector<8x32xf32>
    %cst_134 = arith.constant 2.000000e+00 : f32
    %336 = vector.broadcast %cst_134 : f32 to vector<8x32xf32>
    %337 = arith.mulf %336, %335 : vector<8x32xf32>
    %cst_135 = arith.constant 1.000000e+00 : f32
    %338 = vector.broadcast %cst_135 : f32 to vector<8x32xf32>
    %339 = arith.subf %337, %338 : vector<8x32xf32>
    %340 = vector.extract_strided_slice %332 {offsets = [0, 96], sizes = [8, 32], strides = [1, 1]} : vector<8x128xf32> to vector<8x32xf32>
    %341 = arith.mulf %334, %297 : vector<8x32xf32>
    %342 = arith.mulf %333, %339 : vector<8x32xf32>
    %343 = arith.addf %341, %342 : vector<8x32xf32>
    %344 = math.tanh %343 : vector<8x32xf32>
    %345 = arith.mulf %340, %344 : vector<8x32xf32>
    %346 = arith.negf %321 : vector<8x128xf32>
    %347 = math.exp %346 : vector<8x128xf32>
    %cst_136 = arith.constant 1.000000e+00 : f32
    %348 = vector.broadcast %cst_136 : f32 to vector<8x128xf32>
    %349 = arith.addf %348, %347 : vector<8x128xf32>
    %350 = arith.divf %348, %349 : vector<8x128xf32>
    %351 = vector.extract_strided_slice %350 {offsets = [0, 0], sizes = [8, 32], strides = [1, 1]} : vector<8x128xf32> to vector<8x32xf32>
    %352 = vector.extract_strided_slice %350 {offsets = [0, 32], sizes = [8, 32], strides = [1, 1]} : vector<8x128xf32> to vector<8x32xf32>
    %353 = vector.extract_strided_slice %350 {offsets = [0, 64], sizes = [8, 32], strides = [1, 1]} : vector<8x128xf32> to vector<8x32xf32>
    %cst_137 = arith.constant 2.000000e+00 : f32
    %354 = vector.broadcast %cst_137 : f32 to vector<8x32xf32>
    %355 = arith.mulf %354, %353 : vector<8x32xf32>
    %cst_138 = arith.constant 1.000000e+00 : f32
    %356 = vector.broadcast %cst_138 : f32 to vector<8x32xf32>
    %357 = arith.subf %355, %356 : vector<8x32xf32>
    %358 = vector.extract_strided_slice %350 {offsets = [0, 96], sizes = [8, 32], strides = [1, 1]} : vector<8x128xf32> to vector<8x32xf32>
    %359 = arith.mulf %352, %315 : vector<8x32xf32>
    %360 = arith.mulf %351, %357 : vector<8x32xf32>
    %361 = arith.addf %359, %360 : vector<8x32xf32>
    %362 = math.tanh %361 : vector<8x32xf32>
    %363 = arith.mulf %358, %362 : vector<8x32xf32>
    %c0_139 = arith.constant 0 : index
    %c0_140 = arith.constant 0 : index
    %364 = vector.load %arg10[%c0_139, %c0_140] : memref<32x128xf32, #tpu.memory_space<vmem>>, vector<32x128xf32>
    %cst_141 = arith.constant dense<0.000000e+00> : vector<8x128xf32>
    %365 = tpu.matmul %363, %364, %cst_141 {dimension_numbers = #tpu.dot_dimension_numbers<[1], [0], [0], [1], [0, 0, 1, 1], [], []>} : vector<8x32xf32>, vector<32x128xf32>, vector<8x128xf32> -> vector<8x128xf32>
    %c0_142 = arith.constant 0 : index
    %c0_143 = arith.constant 0 : index
    %366 = vector.load %arg11[%c0_142, %c0_143] : memref<32x128xf32, #tpu.memory_space<vmem>>, vector<32x128xf32>
    %cst_144 = arith.constant dense<0.000000e+00> : vector<8x128xf32>
    %367 = tpu.matmul %345, %366, %cst_144 {dimension_numbers = #tpu.dot_dimension_numbers<[1], [0], [0], [1], [0, 0, 1, 1], [], []>} : vector<8x32xf32>, vector<32x128xf32>, vector<8x128xf32> -> vector<8x128xf32>
    %368 = arith.addf %365, %367 : vector<8x128xf32>
    %369 = arith.addf %368, %23 : vector<8x128xf32>
    %370 = arith.negf %369 : vector<8x128xf32>
    %371 = math.exp %370 : vector<8x128xf32>
    %cst_145 = arith.constant 1.000000e+00 : f32
    %372 = vector.broadcast %cst_145 : f32 to vector<8x128xf32>
    %373 = arith.addf %372, %371 : vector<8x128xf32>
    %374 = arith.divf %372, %373 : vector<8x128xf32>
    %375 = vector.extract_strided_slice %374 {offsets = [0, 0], sizes = [8, 32], strides = [1, 1]} : vector<8x128xf32> to vector<8x32xf32>
    %376 = vector.extract_strided_slice %374 {offsets = [0, 32], sizes = [8, 32], strides = [1, 1]} : vector<8x128xf32> to vector<8x32xf32>
    %377 = vector.extract_strided_slice %374 {offsets = [0, 64], sizes = [8, 32], strides = [1, 1]} : vector<8x128xf32> to vector<8x32xf32>
    %cst_146 = arith.constant 2.000000e+00 : f32
    %378 = vector.broadcast %cst_146 : f32 to vector<8x32xf32>
    %379 = arith.mulf %378, %377 : vector<8x32xf32>
    %cst_147 = arith.constant 1.000000e+00 : f32
    %380 = vector.broadcast %cst_147 : f32 to vector<8x32xf32>
    %381 = arith.subf %379, %380 : vector<8x32xf32>
    %382 = vector.extract_strided_slice %374 {offsets = [0, 96], sizes = [8, 32], strides = [1, 1]} : vector<8x128xf32> to vector<8x32xf32>
    %383 = arith.mulf %376, %343 : vector<8x32xf32>
    %384 = arith.mulf %375, %381 : vector<8x32xf32>
    %385 = arith.addf %383, %384 : vector<8x32xf32>
    %386 = math.tanh %385 : vector<8x32xf32>
    %387 = arith.mulf %382, %386 : vector<8x32xf32>
    %c0_148 = arith.constant 0 : index
    %c0_149 = arith.constant 0 : index
    %388 = vector.load %arg13[%c0_148, %c0_149] : memref<32x32xf32, #tpu.memory_space<vmem>>, vector<32x32xf32>
    %cst_150 = arith.constant dense<0.000000e+00> : vector<8x32xf32>
    %389 = tpu.matmul %12, %388, %cst_150 {dimension_numbers = #tpu.dot_dimension_numbers<[1], [0], [0], [1], [0, 0, 1, 1], [], []>} : vector<8x32xf32>, vector<32x32xf32>, vector<8x32xf32> -> vector<8x32xf32>
    %c0_151 = arith.constant 0 : index
    %c0_152 = arith.constant 0 : index
    %390 = vector.load %arg14[%c0_151, %c0_152] : memref<32x32xf32, #tpu.memory_space<vmem>>, vector<32x32xf32>
    %cst_153 = arith.constant dense<0.000000e+00> : vector<8x32xf32>
    %391 = tpu.matmul %387, %390, %cst_153 {dimension_numbers = #tpu.dot_dimension_numbers<[1], [0], [0], [1], [0, 0, 1, 1], [], []>} : vector<8x32xf32>, vector<32x32xf32>, vector<8x32xf32> -> vector<8x32xf32>
    %392 = arith.addf %389, %391 : vector<8x32xf32>
    %c0_154 = arith.constant 0 : index
    %c0_155 = arith.constant 0 : index
    %393 = vector.load %arg15[%c0_154, %c0_155] : memref<1x32xf32, #tpu.memory_space<vmem>>, vector<1x32xf32>
    %394 = vector.broadcast %393 : vector<1x32xf32> to vector<8x32xf32>
    %395 = arith.addf %392, %394 : vector<8x32xf32>
    %cst_156 = arith.constant 0.000000e+00 : f32
    %396 = vector.broadcast %cst_156 : f32 to vector<8x32xf32>
    %397 = arith.maximumf %395, %396 : vector<8x32xf32>
    %c0_157 = arith.constant 0 : index
    %c0_158 = arith.constant 0 : index
    %398 = vector.load %arg16[%c0_157, %c0_158] : memref<32x128xf32, #tpu.memory_space<vmem>>, vector<32x128xf32>
    %cst_159 = arith.constant dense<0.000000e+00> : vector<8x128xf32>
    %399 = tpu.matmul %397, %398, %cst_159 {dimension_numbers = #tpu.dot_dimension_numbers<[1], [0], [0], [1], [0, 0, 1, 1], [], []>} : vector<8x32xf32>, vector<32x128xf32>, vector<8x128xf32> -> vector<8x128xf32>
    %c0_160 = arith.constant 0 : index
    %c0_161 = arith.constant 0 : index
    %400 = vector.load %arg17[%c0_160, %c0_161] : memref<1x128xf32, #tpu.memory_space<vmem>>, vector<1x128xf32>
    %401 = vector.broadcast %400 : vector<1x128xf32> to vector<8x128xf32>
    %402 = arith.addf %399, %401 : vector<8x128xf32>
    %c0_162 = arith.constant 0 : index
    %c0_163 = arith.constant 0 : index
    %403 = vector.load %arg18[%c0_162, %c0_163] : memref<8x128xf32, #tpu.memory_space<vmem>>, vector<8x128xf32>
    tpu.vector_store %arg18[%c0_162, %c0_163], %402 {strides = array<i32>} : memref<8x128xf32, #tpu.memory_space<vmem>>, vector<8x128xf32>,
    return
  }
  func.func @transform_0(%arg0: i32) -> (i32, i32) {
    %c0_i32 = arith.constant 0 : i32
    %c0_i32_0 = arith.constant 0 : i32
    return %arg0, %c0_i32 : i32, i32
  }
  func.func @transform_1(%arg0: i32) -> (i32, i32, i32) {
    %c0_i32 = arith.constant 0 : i32
    %c0_i32_0 = arith.constant 0 : i32
    %c0_i32_1 = arith.constant 0 : i32
    return %c0_i32, %arg0, %c0_i32_0 : i32, i32, i32
  }
  func.func @transform_2(%arg0: i32) -> (i32, i32) {
    %c0_i32 = arith.constant 0 : i32
    %c0_i32_0 = arith.constant 0 : i32
    %c0_i32_1 = arith.constant 0 : i32
    return %c0_i32, %c0_i32_0 : i32, i32
  }
  func.func @transform_3(%arg0: i32) -> (i32, i32) {
    %c0_i32 = arith.constant 0 : i32
    %c0_i32_0 = arith.constant 0 : i32
    %c0_i32_1 = arith.constant 0 : i32
    return %c0_i32, %c0_i32_0 : i32, i32
  }
  func.func @transform_4(%arg0: i32) -> (i32, i32) {
    %c0_i32 = arith.constant 0 : i32
    %c0_i32_0 = arith.constant 0 : i32
    %c0_i32_1 = arith.constant 0 : i32
    return %c0_i32, %c0_i32_0 : i32, i32
  }
  func.func @transform_5(%arg0: i32) -> (i32, i32) {
    %c0_i32 = arith.constant 0 : i32
    %c0_i32_0 = arith.constant 0 : i32
    %c0_i32_1 = arith.constant 0 : i32
    return %c0_i32, %c0_i32_0 : i32, i32
  }
  func.func @transform_6(%arg0: i32) -> (i32, i32) {
    %c0_i32 = arith.constant 0 : i32
    %c0_i32_0 = arith.constant 0 : i32
    %c0_i32_1 = arith.constant 0 : i32
    return %c0_i32, %c0_i32_0 : i32, i32
  }
  func.func @transform_7(%arg0: i32) -> (i32, i32) {
    %c0_i32 = arith.constant 0 : i32
    %c0_i32_0 = arith.constant 0 : i32
    %c0_i32_1 = arith.constant 0 : i32
    return %c0_i32, %c0_i32_0 : i32, i32
  }
  func.func @transform_8(%arg0: i32) -> (i32, i32) {
    %c0_i32 = arith.constant 0 : i32
    %c0_i32_0 = arith.constant 0 : i32
    %c0_i32_1 = arith.constant 0 : i32
    return %c0_i32, %c0_i32_0 : i32, i32
  }
  func.func @transform_9(%arg0: i32) -> (i32, i32) {
    %c0_i32 = arith.constant 0 : i32
    %c0_i32_0 = arith.constant 0 : i32
    %c0_i32_1 = arith.constant 0 : i32
    return %c0_i32, %c0_i32_0 : i32, i32
  }
  func.func @transform_10(%arg0: i32) -> (i32, i32) {
    %c0_i32 = arith.constant 0 : i32
    %c0_i32_0 = arith.constant 0 : i32
    %c0_i32_1 = arith.constant 0 : i32
    return %c0_i32, %c0_i32_0 : i32, i32
  }
  func.func @transform_11(%arg0: i32) -> (i32, i32) {
    %c0_i32 = arith.constant 0 : i32
    %c0_i32_0 = arith.constant 0 : i32
    %c0_i32_1 = arith.constant 0 : i32
    return %c0_i32, %c0_i32_0 : i32, i32
  }
  func.func @transform_12(%arg0: i32) -> (i32, i32) {
    %c0_i32 = arith.constant 0 : i32
    %c0_i32_0 = arith.constant 0 : i32
    %c0_i32_1 = arith.constant 0 : i32
    return %c0_i32, %c0_i32_0 : i32, i32
  }
  func.func @transform_13(%arg0: i32) -> (i32, i32) {
    %c0_i32 = arith.constant 0 : i32
    %c0_i32_0 = arith.constant 0 : i32
    %c0_i32_1 = arith.constant 0 : i32
    return %c0_i32, %c0_i32_0 : i32, i32
  }
  func.func @transform_14(%arg0: i32) -> (i32, i32) {
    %c0_i32 = arith.constant 0 : i32
    %c0_i32_0 = arith.constant 0 : i32
    %c0_i32_1 = arith.constant 0 : i32
    return %c0_i32, %c0_i32_0 : i32, i32
  }
  func.func @transform_15(%arg0: i32) -> (i32, i32) {
    %c0_i32 = arith.constant 0 : i32
    %c0_i32_0 = arith.constant 0 : i32
    %c0_i32_1 = arith.constant 0 : i32
    return %c0_i32, %c0_i32_0 : i32, i32
  }
  func.func @transform_16(%arg0: i32) -> (i32, i32) {
    %c0_i32 = arith.constant 0 : i32
    %c0_i32_0 = arith.constant 0 : i32
    %c0_i32_1 = arith.constant 0 : i32
    return %c0_i32, %c0_i32_0 : i32, i32
  }
  func.func @transform_17(%arg0: i32) -> (i32, i32) {
    %c0_i32 = arith.constant 0 : i32
    %c0_i32_0 = arith.constant 0 : i32
    return %arg0, %c0_i32 : i32, i32
  }
}

</mosaic_0001>

<bundles_post_ra>
// kernel: dynamics_lstm_forward.1
= control target key start
LH: loop header
LB: loop body
LE: loop exit
PB: predicated region body
PF: predicated region fallthrough
CT: control target
= control target key end

     0   :  { %vm136_vm0 = vcmask 64512   ;;  %s1647_s18 = smov 64   ;;  %s1648_s19 = smov 32   ;;  %vm66_vm5 = vcmask 1043456   ;;  %vm62_vm6 = vcmask 31744   ;;  %vm99_vm7 = vcmask 261120   ;;  %s2177_s6 = inlined_call_operand.vmem [shape: f32[8,128], index: 6, kind: input, shape index: {}]   ;;  %s2178_s1 = inlined_call_operand.vmem [shape: f32[8,8,8], index: 1, kind: input, shape index: {}]   ;;  %s2179_s7 = inlined_call_operand.vmem [shape: f32[1,128], index: 7, kind: input, shape index: {}]   ;;  %s2180_s2 = inlined_call_operand.vmem [shape: f32[4,32], index: 2, kind: input, shape index: {}]   ;;  %s2181_s0 = inlined_call_operand.vmem [shape: f32[8,4], index: 0, kind: input, shape index: {}]   ;;  %s2182_s9 = inlined_call_operand.vmem [shape: f32[32,128], index: 9, kind: input, shape index: {}]   ;;  %s2183_s8 = inlined_call_operand.vmem [shape: f32[32,128], index: 8, kind: input, shape index: {}]   ;;  %s2184_s3 = inlined_call_operand.vmem [shape: f32[1,32], index: 3, kind: input, shape index: {}]   ;;  %s2185_s11 = inlined_call_operand.vmem [shape: f32[1,128], index: 11, kind: input, shape index: {}]   ;;  %s2186_s4 = inlined_call_operand.vmem [shape: f32[32,32], index: 4, kind: input, shape index: {}]   ;;  %s2187_s5 = inlined_call_operand.vmem [shape: f32[1,32], index: 5, kind: input, shape index: {}]   ;;  %s2188_s12 = inlined_call_operand.vmem [shape: f32[32,32], index: 12, kind: input, shape index: {}]   ;;  %s2189_s10 = inlined_call_operand.vmem [shape: f32[32,128], index: 10, kind: input, shape index: {}]   ;;  %s2190_s13 = inlined_call_operand.vmem [shape: f32[32,32], index: 13, kind: input, shape index: {}]   ;;  %s2191_s14 = inlined_call_operand.vmem [shape: f32[1,32], index: 14, kind: input, shape index: {}]   ;;  %s2192_s15 = inlined_call_operand.vmem [shape: f32[32,128], index: 15, kind: input, shape index: {}]   ;;  %s2193_s16 = inlined_call_operand.vmem [shape: f32[1,128], index: 16, kind: input, shape index: {}]   ;;  %s2194_s17 = inlined_call_operand.vmem [shape: f32[8,128], index: 17, kind: output, shape index: {}]  }
   0x1   :  { %2196 = sst [smem:[#allocation3_spill]] %s2177_s6  ;;  %v1749_v2 = vld [vmem:[%s2179_s7] ss:$0 sm:$0xff]  ;;  %v1767_v28 = vld [vmem:[%s2182_s9 + $0x18] sm:$0xff]  ;;  %v1777_v30 = vld [vmem:[%s2183_s8 + $0x10] sm:$0xff] }
   0x2   :  { %2197 = sst [smem:[#allocation4_spill]] %s2178_s1  ;;  %v57_v26 = vld [vmem:[%s2180_s2] sm:$0xf]  ;;  %v1772_v29 = vld [vmem:[%s2183_s8 + $0x18] sm:$0xff]  ;;  %v1783_v31 = vld [vmem:[%s2182_s9 + $0x10] sm:$0xff] }
   0x3   :  { %s2198_s26 = sld [smem:[#allocation3_spill]]  ;;  %v56_v27 = vld [vmem:[%s2181_s0] sm:$0xff]  ;;  %1469 = vmatpush.msk.msra.mxu0 %vm66_vm5, %v57_v26  ;;  %275 = vmatpush.msra.mxu3 %v1772_v29  ;;  %v1792_v33 = vld [vmem:[%s2183_s8 + $0x8] sm:$0xff]  ;;  %v94_v39 = vld [vmem:[%s2186_s4 + $0x18] sm:$0xff] }
   0x4   :  { %s2199_s29 = sld [smem:[#allocation4_spill]]  ;;  %1470 = vmatmul.msk.f32.vlgmr.msra.gmra.mxu0 %vm62_vm6, %v56_v27  ;;  %v1799_v34 = vld [vmem:[%s2182_s9 + $0x8] sm:$0xff]  ;;  %v1805_v35 = vld [vmem:[%s2183_s8] sm:$0xff]  ;;  %v93_v40 = vld [vmem:[%s2186_s4 + $0x10] sm:$0xff]  ;;  %115 = vmatpush.msra.mxu1 %v94_v39 }
   0x5   :  { %300 = vmatpush.msrb.mxu0 %v1767_v28  ;;  %276 = vmatpush.msra.mxu3 %v1777_v30  ;;  %v1811_v36 = vld [vmem:[%s2182_s9] sm:$0xff]  ;;  %v92_v41 = vld [vmem:[%s2186_s4 + $0x8] sm:$0xff] }
   0x6   :  { %116 = vmatpush.msra.mxu1 %v93_v40  ;;  %v91_v42 = vld [vmem:[%s2186_s4] sm:$0xff] }
   0x7   :  { %301 = vmatpush.msrb.mxu0 %v1783_v31  ;;  %277 = vmatpush.msra.mxu3 %v1792_v33  ;;  %v1540_v43 = vld [vmem:[%s2184_s3] ss:$0 sm:$0xff] }
   0x8   :  { %117 = vmatpush.msra.mxu1 %v92_v41  ;;  %v1854_v48 = vld [vmem:[%s2185_s11] ss:$0 sm:$0xff] }
   0x9   :  { %v131_v0 = vld [vmem:[%s2198_s26] sm:$0xff]  ;;  %302 = vmatpush.msrb.mxu0 %v1799_v34  ;;  %278 = vmatpush.msra.mxu3 %v1805_v35 }
   0xa   :  { %v123_v1 = vld [vmem:[%s2199_s29] sm:$0xff]  ;;  %176 = vmatpush.msra.mxu2 %v131_v0  ;;  %v124_v32 = vld [vmem:[%s2199_s29 + $0x8] sm:$0xff]  ;;  %118 = vmatpush.msra.mxu1 %v91_v42  ;;  %v125_v58 = vld [vmem:[%s2199_s29 + $0x10] sm:$0xff] }
   0xb   :  { %1472 = vmatmul.msk.f32.vlgmr.msra.gmra.mxu2 %vm136_vm0, %v123_v1  ;;  %303 = vmatpush.msrb.mxu0 %v1811_v36  ;;  %v126_v61 = vld [vmem:[%s2199_s29 + $0x18] sm:$0xff]  ;;  %v1373_v1 = vld [vmem:[%s2188_s12 + $0x10] sm:$0xff]  ;;  %v1542_v41 = vld [vmem:[%s2187_s5] ss:$0 sm:$0xff] }
   0xc   :  { %402 = vmatpush.msrb.mxu1 %v1772_v29  ;;  %v1374_v0 = vld [vmem:[%s2188_s12 + $0x18] sm:$0xff]  ;;  %v129_v39 = vld [vmem:[%s2199_s29 + $0x30] sm:$0xff] }
   0xd   :  { %452 = vmatpush.msra.mxu0 %v1767_v28  ;;  %1419 = vmatpush.msrb.mxu2 %v1374_v0  ;;  %v130_v40 = vld [vmem:[%s2199_s29 + $0x38] sm:$0xff] }
   0xe   :  { %403 = vmatpush.msrb.mxu1 %v1777_v30 }
   0xf   :  { %453 = vmatpush.msra.mxu0 %v1783_v31  ;;  %1420 = vmatpush.msrb.mxu2 %v1373_v1 }
  0x10   :  { %404 = vmatpush.msrb.mxu1 %v1792_v33 }
  0x11   :  { %454 = vmatpush.msra.mxu0 %v1799_v34 }
  0x12   :  { %405 = vmatpush.msrb.mxu1 %v1805_v35 }
  0x13   :  { %1473 = vmatmul.msk.f32.gmra.mxu2 %vm136_vm0, %v124_v32  ;;  %455 = vmatpush.msra.mxu0 %v1811_v36 }
  0x1b   :  { %1474 = vmatmul.msk.f32.gmra.mxu2 %vm136_vm0, %v125_v58 }
  0x23   :  { %1475 = vmatmul.msk.f32.gmra.mxu2 %vm136_vm0, %v126_v61  ;;  %v1932_v61 = vld [vmem:[%s2189_s10] sm:$0xff] }
  0x81   :  { %v87_v44 = vpop.f32.mrf.mxu0 }
  0x82   :  { %v88_v45 = vadd.f32 %v1540_v43, %v87_v44 }
  0x84   :  { %v90_v46 = vmax.f32 %v88_v45, 0.0 }
  0x86   :  { %1471 = vmatmul.msk.f32.vlgmr.msra.gmra.mxu1 %vm99_vm7, %v90_v46 }
  0x87   :  { %555 = vmatpush.msra.mxu1 %v1772_v29 }
  0x89   :  { %556 = vmatpush.msra.mxu1 %v1777_v30 }
  0x8b   :  { %557 = vmatpush.msra.mxu1 %v1792_v33 }
  0x8d   :  { %558 = vmatpush.msra.mxu1 %v1805_v35 }
  0x8e   :  { %v178_v3 = vpop.f32.mrf.mxu2 }
  0x8f   :  { %v179_v4 = vadd.f32 %v1749_v2, %v178_v3 }
  0x91   :  { %v1480_v5 = vmul.f32 -1.442695, %v179_v4  ;;  %v1372_v4 = vld [vmem:[%s2188_s12 + $0x8] sm:$0xff] }
  0x92   :  { %1421 = vmatpush.msrb.mxu2 %v1372_v4 }
  0x93   :  { %1545 = vpow2.f32 %v1480_v5 }
  0x96   :  { %v181_v50 = vpop.f32.mrf.mxu2 }
  0x97   :  { %v182_v53 = vadd.f32 %v1749_v2, %v181_v50 }
  0x99   :  { %v1546_v6 = vpop.eup %1545 }
  0x9a   :  { %v218_v7 = vadd.f32 1.0, %v1546_v6 }
  0x9c   :  { %1547 = vrcp.f32 %v218_v7  ;;  %v230_v11 = vand.u32 2147483648, %v218_v7  ;;  %v228_v13 = vand.u32 2147483647, %v218_v7  ;;  %vm224_vm2 = vweird.f32 %v218_v7 }
  0x9e   :  { %v231_v15 = vor.u32 1.1754944e-38, %v230_v11  ;;  %vm229_vm4 = vcmp.eq.f32.partialorder %v228_v13, 8.507059e+37 }
  0xa2   :  { %v1548_v8 = vpop.eup %1547 }
  0xa3   :  { %v220_v9 = vmul.f32 %v1548_v8, %v218_v7  ;;  %vm225_vm1 = vweird.f32 %v1548_v8  ;;  %v1371_v7 = vld [vmem:[%s2188_s12] sm:$0xff] }
  0xa4   :  { %vm226_vm3 = vmor %vm224_vm2, %vm225_vm1  ;;  %1422 = vmatpush.msrb.mxu2 %v1371_v7 }
  0xa5   :  { %v221_v10 = vsub.f32 1.0, %v220_v9 }
  0xa7   :  { %v222_v12 = vmul.f32 %v1548_v8, %v221_v10  ;;  %v127_v10 = vld [vmem:[%s2199_s29 + $0x20] sm:$0xff] }
  0xa8   :  { %1476 = vmatmul.msk.f32.gmra.mxu2 %vm136_vm0, %v127_v10 }
  0xa9   :  { %v223_v14 = vadd.f32 %v1548_v8, %v222_v12 }
  0xab   :  { %v227_v16 = vsel %vm226_vm3, %v1548_v8, %v223_v14 }
  0xac   :  { %v232_v17 = vsel %vm229_vm4, %v231_v15, %v227_v16 }
  0xad   :  { %v234_v18 = vmul.f32 2.0, %v232_v17  ;;  %v236_v22 = vmul.f32 0.0, %v232_v17 }
  0xaf   :  { %v1481_v19 = vadd.f32 -1.0, %v234_v18 }
  0xb1   :  { %238 = vrot.lane.b32.xlu0 %v1481_v19, %s1647_s18 }
 0x103   :  { %v120_v42 = vpop.f32.mrf.mxu1 }
 0x104   :  { %v121_v43 = vadd.f32 %v1542_v41, %v120_v42 }
 0x123   :  { %v239_v20 = vpop.permute.xlu0 %238 }
 0x124   :  { %v241_v21 = vmul.f32 %v239_v20, %v232_v17 }
 0x126   :  { %243 = vrot.lane.b32.xlu0 %v241_v21, %s1648_s19 }
 0x198   :  { %v244_v23 = vpop.permute.xlu0 %243 }
 0x199   :  { %v1754_v24 = vadd.f32 %v244_v23, %v236_v22 }
 0x19b   :  { %1549 = vtanh.f32 %v1754_v24 }
 0x1a1   :  { %v1550_v25 = vpop.eup %1549 }
 0x1a2   :  { %249 = vrot.lane.b32.xlu1 %v1550_v25, %s1647_s18  ;;  %v128_v25 = vld [vmem:[%s2199_s29 + $0x28] sm:$0xff] }
 0x1a3   :  { %1477 = vmatmul.msk.f32.gmra.mxu2 %vm136_vm0, %v128_v25 }
 0x1ab   :  { %1478 = vmatmul.msk.f32.gmra.mxu2 %vm136_vm0, %v129_v39 }
 0x1b3   :  { %1479 = vmatmul.msk.f32.gmra.mxu2 %vm136_vm0, %v130_v40 }
 0x1bb   :  { %1535 = vmatmul.msk.f32.vlgmr.msrb.gmra.mxu2 %vm99_vm7, %v121_v43 }
 0x214   :  { %v250_v37 = vpop.permute.xlu1 %249 }
 0x215   :  { %v252_v38 = vmul.f32 %v250_v37, %v232_v17 }
 0x217   :  { %259 = vrot.lane.b32.xlu1 %v252_v38, %s1648_s19 }
 0x289   :  { %v260_v47 = vpop.permute.xlu1 %259 }
 0x28a   :  { %1482 = vmatmul.msk.f32.vlgmr.msra.gmra.mxu3 %vm99_vm7, %v260_v47  ;;  %1483 = vmatmul.msk.f32.vlgmr.msrb.gmra.mxu0 %vm99_vm7, %v260_v47 }
 0x28b   :  { %601 = vmatpush.msrb.mxu0 %v1767_v28 }
 0x28d   :  { %602 = vmatpush.msrb.mxu0 %v1783_v31 }
 0x28f   :  { %603 = vmatpush.msrb.mxu0 %v1799_v34 }
 0x291   :  { %604 = vmatpush.msrb.mxu0 %v1811_v36 }
 0x307   :  { %v305_v49 = vpop.f32.mrf.mxu0 }
 0x308   :  { %v306_v51 = vadd.f32 %v1854_v48, %v305_v49 }
 0x30a   :  { %v1484_v52 = vmul.f32 -1.442695, %v306_v51 }
 0x30c   :  { %1551 = vpow2.f32 %v1484_v52 }
 0x30d   :  { %v280_v54 = vpop.f32.mrf.mxu3 }
 0x30e   :  { %v283_v55 = vadd.f32 %v280_v54, %v182_v53 }
 0x310   :  { %v1486_v56 = vmul.f32 -1.442695, %v283_v55 }
 0x312   :  { %v1552_v57 = vpop.eup %1551  ;;  %1553 = vpow2.f32 %v1486_v56 }
 0x313   :  { %v311_v59 = vadd.f32 1.0, %v1552_v57 }
 0x315   :  { %1555 = vrcp.f32 %v311_v59  ;;  %v323_v6 = vand.u32 2147483648, %v311_v59  ;;  %v321_v9 = vand.u32 2147483647, %v311_v59  ;;  %vm317_vm9 = vweird.f32 %v311_v59 }
 0x317   :  { %v324_v14 = vor.u32 1.1754944e-38, %v323_v6  ;;  %vm322_vm11 = vcmp.eq.f32.partialorder %v321_v9, 8.507059e+37 }
 0x318   :  { %v1554_v60 = vpop.eup %1553 }
 0x319   :  { %v349_v62 = vadd.f32 1.0, %v1554_v60  ;;  %v1926_v60 = vld [vmem:[%s2189_s10 + $0x8] sm:$0xff] }
 0x31b   :  { %v1556_v63 = vpop.eup %1555  ;;  %1557 = vrcp.f32 %v349_v62  ;;  %v361_v18 = vand.u32 2147483648, %v349_v62  ;;  %v359_v21 = vand.u32 2147483647, %v349_v62  ;;  %vm355_vm13 = vweird.f32 %v349_v62 }
 0x31c   :  { %v313_v3 = vmul.f32 %v1556_v63, %v311_v59  ;;  %vm318_vm8 = vweird.f32 %v1556_v63  ;;  %v1915_v59 = vld [vmem:[%s2189_s10 + $0x18] sm:$0xff] }
 0x31d   :  { %vm319_vm10 = vmor %vm317_vm9, %vm318_vm8  ;;  %v362_v26 = vor.u32 1.1754944e-38, %v361_v18  ;;  %vm360_vm15 = vcmp.eq.f32.partialorder %v359_v21, 8.507059e+37  ;;  %432 = vmatpush.msrb.mxu3 %v1915_v59 }
 0x31e   :  { %v314_v5 = vsub.f32 1.0, %v313_v3  ;;  %v184_v3 = vpop.f32.mrf.mxu2 }
 0x31f   :  { %v185_v4 = vadd.f32 %v1749_v2, %v184_v3 }
 0x320   :  { %v315_v8 = vmul.f32 %v1556_v63, %v314_v5 }
 0x321   :  { %v1558_v11 = vpop.eup %1557 }
 0x322   :  { %v351_v12 = vmul.f32 %v1558_v11, %v349_v62  ;;  %v316_v13 = vadd.f32 %v1556_v63, %v315_v8  ;;  %vm356_vm12 = vweird.f32 %v1558_v11 }
 0x323   :  { %vm357_vm14 = vmor %vm355_vm13, %vm356_vm12 }
 0x324   :  { %v352_v15 = vsub.f32 1.0, %v351_v12  ;;  %v320_v16 = vsel %vm319_vm10, %v1556_v63, %v316_v13 }
 0x325   :  { %v325_v17 = vsel %vm322_vm11, %v324_v14, %v320_v16 }
 0x326   :  { %v327_v19 = vmul.f32 2.0, %v325_v17  ;;  %v353_v20 = vmul.f32 %v1558_v11, %v352_v15  ;;  %v329_v49 = vmul.f32 0.0, %v325_v17 }
 0x328   :  { %v1485_v22 = vadd.f32 -1.0, %v327_v19  ;;  %v354_v23 = vadd.f32 %v1558_v11, %v353_v20 }
 0x32a   :  { %331 = vrot.lane.b32.xlu2 %v1485_v22, %s1647_s18  ;;  %v358_v27 = vsel %vm357_vm14, %v1558_v11, %v354_v23 }
 0x32b   :  { %v363_v32 = vsel %vm360_vm15, %v362_v26, %v358_v27 }
 0x32c   :  { %v365_v37 = vmul.f32 2.0, %v363_v32  ;;  %v367_v52 = vmul.f32 %v363_v32, %v1754_v24  ;;  %v1920_v24 = vld [vmem:[%s2189_s10 + $0x10] sm:$0xff] }
 0x32d   :  { %433 = vmatpush.msrb.mxu3 %v1920_v24 }
 0x32e   :  { %v1487_v38 = vadd.f32 -1.0, %v365_v37 }
 0x32f   :  { %434 = vmatpush.msrb.mxu3 %v1926_v60 }
 0x331   :  { %435 = vmatpush.msrb.mxu3 %v1932_v61 }
 0x332   :  { %369 = vrot.lane.b32.xlu2 %v1487_v38, %s1647_s18 }
 0x333   :  { %581 = vmatpush.msra.mxu3 %v1915_v59 }
 0x335   :  { %582 = vmatpush.msra.mxu3 %v1920_v24 }
 0x337   :  { %583 = vmatpush.msra.mxu3 %v1926_v60 }
 0x339   :  { %584 = vmatpush.msra.mxu3 %v1932_v61 }
 0x384   :  { %v332_v44 = vpop.permute.xlu2 %331 }
 0x385   :  { %v334_v45 = vmul.f32 %v332_v44, %v325_v17 }
 0x387   :  { %336 = vrot.lane.b32.xlu0 %v334_v45, %s1648_s19 }
 0x38c   :  { %v370_v46 = vpop.permute.xlu2 %369 }
 0x38d   :  { %v372_v47 = vmul.f32 %v370_v46, %v363_v32 }
 0x38f   :  { %374 = vrot.lane.b32.xlu1 %v372_v47, %s1648_s19 }
 0x3f9   :  { %v337_v50 = vpop.permute.xlu0 %336 }
 0x3fa   :  { %v1902_v51 = vadd.f32 %v337_v50, %v329_v49 }
 0x3fc   :  { %1559 = vtanh.f32 %v1902_v51 }
 0x401   :  { %v375_v53 = vpop.permute.xlu1 %374 }
 0x402   :  { %v1560_v54 = vpop.eup %1559  ;;  %v1906_v55 = vadd.f32 %v375_v53, %v367_v52 }
 0x403   :  { %342 = vrot.lane.b32.xlu2 %v1560_v54, %s1647_s18 }
 0x404   :  { %1561 = vtanh.f32 %v1906_v55 }
 0x40a   :  { %v1562_v56 = vpop.eup %1561 }
 0x40b   :  { %380 = vrot.lane.b32.xlu0 %v1562_v56, %s1647_s18 }
 0x45d   :  { %v343_v57 = vpop.permute.xlu2 %342 }
 0x45e   :  { %v345_v58 = vmul.f32 %v343_v57, %v325_v17 }
 0x460   :  { %416 = vrot.lane.b32.xlu1 %v345_v58, %s1648_s19 }
 0x47d   :  { %v381_v62 = vpop.permute.xlu0 %380 }
 0x47e   :  { %v383_v63 = vmul.f32 %v381_v62, %v363_v32 }
 0x480   :  { %386 = vrot.lane.b32.xlu2 %v383_v63, %s1648_s19 }
 0x4d2   :  { %v417_v0 = vpop.permute.xlu1 %416 }
 0x4d3   :  { %1489 = vmatmul.msk.f32.vlgmr.msrb.gmra.mxu3 %vm99_vm7, %v417_v0 }
 0x4d4   :  { %730 = vmatpush.msrb.mxu3 %v1915_v59 }
 0x4d6   :  { %731 = vmatpush.msrb.mxu3 %v1920_v24 }
 0x4d8   :  { %732 = vmatpush.msrb.mxu3 %v1926_v60 }
 0x4da   :  { %v387_v1 = vpop.permute.xlu2 %386  ;;  %733 = vmatpush.msrb.mxu3 %v1932_v61 }
 0x4db   :  { %1488 = vmatmul.msk.f32.vlgmr.msrb.gmra.mxu1 %vm99_vm7, %v387_v1  ;;  %1490 = vmatmul.msk.f32.vlgmr.msra.gmra.mxu0 %vm99_vm7, %v387_v1 }
 0x4dc   :  { %704 = vmatpush.msrb.mxu1 %v1772_v29  ;;  %750 = vmatpush.msra.mxu0 %v1767_v28 }
 0x4de   :  { %705 = vmatpush.msrb.mxu1 %v1777_v30  ;;  %751 = vmatpush.msra.mxu0 %v1783_v31 }
 0x4e0   :  { %706 = vmatpush.msrb.mxu1 %v1792_v33  ;;  %752 = vmatpush.msra.mxu0 %v1799_v34 }
 0x4e2   :  { %707 = vmatpush.msrb.mxu1 %v1805_v35  ;;  %753 = vmatpush.msra.mxu0 %v1811_v36 }
 0x556   :  { %v437_v5 = vpop.f32.mrf.mxu3 }
 0x558   :  { %v407_v6 = vpop.f32.mrf.mxu1  ;;  %v457_v7 = vpop.f32.mrf.mxu0 }
 0x559   :  { %v410_v8 = vadd.f32 %v407_v6, %v185_v4  ;;  %v458_v9 = vadd.f32 %v457_v7, %v437_v5 }
 0x55b   :  { %v1493_v10 = vmul.f32 -1.442695, %v410_v8  ;;  %v460_v11 = vadd.f32 %v1854_v48, %v458_v9  ;;  %v187_v9 = vpop.f32.mrf.mxu2 }
 0x55d   :  { %1563 = vpow2.f32 %v1493_v10  ;;  %v1491_v12 = vmul.f32 -1.442695, %v460_v11  ;;  %v188_v10 = vadd.f32 %v1749_v2, %v187_v9 }
 0x55f   :  { %1565 = vpow2.f32 %v1491_v12 }
 0x563   :  { %v1564_v13 = vpop.eup %1563 }
 0x564   :  { %v502_v14 = vadd.f32 1.0, %v1564_v13 }
 0x565   :  { %v1566_v15 = vpop.eup %1565 }
 0x566   :  { %1567 = vrcp.f32 %v502_v14  ;;  %v464_v16 = vadd.f32 1.0, %v1566_v15  ;;  %v514_v22 = vand.u32 2147483648, %v502_v14  ;;  %v512_v26 = vand.u32 2147483647, %v502_v14 }
 0x567   :  { %vm508_vm1 = vweird.f32 %v502_v14 }
 0x568   :  { %1569 = vrcp.f32 %v464_v16  ;;  %v476_v27 = vand.u32 2147483648, %v464_v16  ;;  %v474_v38 = vand.u32 2147483647, %v464_v16  ;;  %v515_v39 = vor.u32 1.1754944e-38, %v514_v22 }
 0x569   :  { %vm513_vm4 = vcmp.eq.f32.partialorder %v512_v26, 8.507059e+37  ;;  %vm470_vm5 = vweird.f32 %v464_v16 }
 0x56a   :  { %v477_v43 = vor.u32 1.1754944e-38, %v476_v27  ;;  %vm475_vm8 = vcmp.eq.f32.partialorder %v474_v38, 8.507059e+37 }
 0x56c   :  { %v1568_v17 = vpop.eup %1567 }
 0x56d   :  { %v504_v18 = vmul.f32 %v1568_v17, %v502_v14  ;;  %vm509_vm0 = vweird.f32 %v1568_v17 }
 0x56e   :  { %v1570_v19 = vpop.eup %1569  ;;  %vm510_vm3 = vmor %vm508_vm1, %vm509_vm0 }
 0x56f   :  { %v505_v20 = vsub.f32 1.0, %v504_v18  ;;  %v466_v21 = vmul.f32 %v1570_v19, %v464_v16  ;;  %vm471_vm2 = vweird.f32 %v1570_v19 }
 0x570   :  { %vm472_vm6 = vmor %vm470_vm5, %vm471_vm2 }
 0x571   :  { %v467_v23 = vsub.f32 1.0, %v466_v21  ;;  %v506_v25 = vmul.f32 %v1568_v17, %v505_v20 }
 0x573   :  { %v507_v32 = vadd.f32 %v1568_v17, %v506_v25  ;;  %v468_v37 = vmul.f32 %v1570_v19, %v467_v23 }
 0x575   :  { %v511_v40 = vsel %vm510_vm3, %v1568_v17, %v507_v32  ;;  %v469_v41 = vadd.f32 %v1570_v19, %v468_v37 }
 0x576   :  { %v516_v42 = vsel %vm513_vm4, %v515_v39, %v511_v40 }
 0x577   :  { %v518_v44 = vmul.f32 2.0, %v516_v42  ;;  %v473_v45 = vsel %vm472_vm6, %v1570_v19, %v469_v41  ;;  %v520_v0 = vmul.f32 %v516_v42, %v1906_v55 }
 0x578   :  { %v478_v46 = vsel %vm475_vm8, %v477_v43, %v473_v45 }
 0x579   :  { %v1494_v47 = vadd.f32 -1.0, %v518_v44  ;;  %v480_v49 = vmul.f32 2.0, %v478_v46  ;;  %v482_v57 = vmul.f32 %v478_v46, %v1902_v51 }
 0x57b   :  { %522 = vrot.lane.b32.xlu1 %v1494_v47, %s1647_s18  ;;  %v1492_v50 = vadd.f32 -1.0, %v480_v49 }
 0x57d   :  { %484 = vrot.lane.b32.xlu0 %v1492_v50, %s1647_s18 }
 0x5ed   :  { %v523_v52 = vpop.permute.xlu1 %522 }
 0x5ee   :  { %v525_v53 = vmul.f32 %v523_v52, %v516_v42 }
 0x5ef   :  { %v485_v54 = vpop.permute.xlu0 %484 }
 0x5f0   :  { %v487_v56 = vmul.f32 %v485_v54, %v478_v46  ;;  %527 = vrot.lane.b32.xlu0 %v525_v53, %s1648_s19 }
 0x5f2   :  { %489 = vrot.lane.b32.xlu2 %v487_v56, %s1648_s19 }
 0x64c   :  { %v490_v58 = vpop.permute.xlu2 %489 }
 0x64d   :  { %v1963_v62 = vadd.f32 %v490_v58, %v482_v57 }
 0x64f   :  { %1571 = vtanh.f32 %v1963_v62 }
 0x655   :  { %v1572_v63 = vpop.eup %1571 }
 0x656   :  { %495 = vrot.lane.b32.xlu1 %v1572_v63, %s1647_s18 }
 0x662   :  { %v528_v1 = vpop.permute.xlu0 %527 }
 0x663   :  { %v1968_v3 = vadd.f32 %v528_v1, %v520_v0 }
 0x665   :  { %1573 = vtanh.f32 %v1968_v3 }
 0x66b   :  { %v1574_v4 = vpop.eup %1573 }
 0x66c   :  { %533 = vrot.lane.b32.xlu2 %v1574_v4, %s1647_s18 }
 0x6c6   :  { %v534_v5 = vpop.permute.xlu2 %533 }
 0x6c7   :  { %v536_v51 = vmul.f32 %v534_v5, %v516_v42 }
 0x6c8   :  { %v496_v6 = vpop.permute.xlu1 %495 }
 0x6c9   :  { %v498_v7 = vmul.f32 %v496_v6, %v478_v46  ;;  %539 = vrot.lane.b32.xlu1 %v536_v51, %s1648_s19 }
 0x6cb   :  { %565 = vrot.lane.b32.xlu0 %v498_v7, %s1648_s19 }
 0x73b   :  { %v540_v8 = vpop.permute.xlu1 %539 }
 0x73c   :  { %1495 = vmatmul.msk.f32.vlgmr.msra.gmra.mxu1 %vm99_vm7, %v540_v8  ;;  %1497 = vmatmul.msk.f32.vlgmr.msrb.gmra.mxu0 %vm99_vm7, %v540_v8 }
 0x73d   :  { %v566_v55 = vpop.permute.xlu0 %565  ;;  %853 = vmatpush.msra.mxu1 %v1772_v29  ;;  %899 = vmatpush.msrb.mxu0 %v1767_v28 }
 0x73e   :  { %1496 = vmatmul.msk.f32.vlgmr.msra.gmra.mxu3 %vm99_vm7, %v566_v55 }
 0x73f   :  { %854 = vmatpush.msra.mxu1 %v1777_v30  ;;  %900 = vmatpush.msrb.mxu0 %v1783_v31 }
 0x740   :  { %879 = vmatpush.msra.mxu3 %v1915_v59 }
 0x741   :  { %855 = vmatpush.msra.mxu1 %v1792_v33  ;;  %901 = vmatpush.msrb.mxu0 %v1799_v34 }
 0x742   :  { %880 = vmatpush.msra.mxu3 %v1920_v24 }
 0x743   :  { %856 = vmatpush.msra.mxu1 %v1805_v35  ;;  %902 = vmatpush.msrb.mxu0 %v1811_v36 }
 0x744   :  { %881 = vmatpush.msra.mxu3 %v1926_v60 }
 0x746   :  { %882 = vmatpush.msra.mxu3 %v1932_v61 }
 0x7b9   :  { %v560_v11 = vpop.f32.mrf.mxu1  ;;  %v606_v14 = vpop.f32.mrf.mxu0 }
 0x7ba   :  { %v563_v12 = vadd.f32 %v560_v11, %v188_v10 }
 0x7bc   :  { %v1500_v13 = vmul.f32 -1.442695, %v563_v12 }
 0x7be   :  { %1575 = vpow2.f32 %v1500_v13 }
 0x7c1   :  { %v586_v15 = vpop.f32.mrf.mxu3 }
 0x7c2   :  { %v607_v16 = vadd.f32 %v606_v14, %v586_v15  ;;  %v190_v15 = vpop.f32.mrf.mxu2 }
 0x7c4   :  { %v1576_v17 = vpop.eup %1575  ;;  %v609_v18 = vadd.f32 %v1854_v48, %v607_v16  ;;  %v191_v16 = vadd.f32 %v1749_v2, %v190_v15 }
 0x7c5   :  { %v651_v19 = vadd.f32 1.0, %v1576_v17 }
 0x7c6   :  { %v1498_v20 = vmul.f32 -1.442695, %v609_v18 }
 0x7c7   :  { %1577 = vrcp.f32 %v651_v19  ;;  %v663_v27 = vand.u32 2147483648, %v651_v19  ;;  %v661_v37 = vand.u32 2147483647, %v651_v19  ;;  %vm657_vm10 = vweird.f32 %v651_v19 }
 0x7c8   :  { %1579 = vpow2.f32 %v1498_v20 }
 0x7c9   :  { %v664_v39 = vor.u32 1.1754944e-38, %v663_v27  ;;  %vm662_vm12 = vcmp.eq.f32.partialorder %v661_v37, 8.507059e+37 }
 0x7cd   :  { %v1578_v21 = vpop.eup %1577 }
 0x7ce   :  { %v1580_v22 = vpop.eup %1579  ;;  %v653_v23 = vmul.f32 %v1578_v21, %v651_v19  ;;  %vm658_vm9 = vweird.f32 %v1578_v21 }
 0x7cf   :  { %v613_v25 = vadd.f32 1.0, %v1580_v22  ;;  %vm659_vm11 = vmor %vm657_vm10, %vm658_vm9 }
 0x7d0   :  { %v654_v26 = vsub.f32 1.0, %v653_v23 }
 0x7d1   :  { %1581 = vrcp.f32 %v613_v25  ;;  %v625_v47 = vand.u32 2147483648, %v613_v25  ;;  %v623_v50 = vand.u32 2147483647, %v613_v25  ;;  %vm619_vm14 = vweird.f32 %v613_v25 }
 0x7d2   :  { %v655_v32 = vmul.f32 %v1578_v21, %v654_v26 }
 0x7d3   :  { %v626_v53 = vor.u32 1.1754944e-38, %v625_v47  ;;  %vm624_vm0 = vcmp.eq.f32.partialorder %v623_v50, 8.507059e+37 }
 0x7d4   :  { %v656_v38 = vadd.f32 %v1578_v21, %v655_v32 }
 0x7d6   :  { %v660_v40 = vsel %vm659_vm11, %v1578_v21, %v656_v38 }
 0x7d7   :  { %v1582_v41 = vpop.eup %1581  ;;  %v665_v42 = vsel %vm662_vm12, %v664_v39, %v660_v40 }
 0x7d8   :  { %v615_v43 = vmul.f32 %v1582_v41, %v613_v25  ;;  %v667_v44 = vmul.f32 2.0, %v665_v42  ;;  %vm620_vm13 = vweird.f32 %v1582_v41  ;;  %v669_v5 = vmul.f32 %v665_v42, %v1968_v3 }
 0x7d9   :  { %vm621_vm15 = vmor %vm619_vm14, %vm620_vm13 }
 0x7da   :  { %v616_v45 = vsub.f32 1.0, %v615_v43  ;;  %v1501_v46 = vadd.f32 -1.0, %v667_v44 }
 0x7dc   :  { %671 = vrot.lane.b32.xlu0 %v1501_v46, %s1647_s18  ;;  %v617_v49 = vmul.f32 %v1582_v41, %v616_v45 }
 0x7de   :  { %v618_v52 = vadd.f32 %v1582_v41, %v617_v49 }
 0x7e0   :  { %v622_v54 = vsel %vm621_vm15, %v1582_v41, %v618_v52 }
 0x7e1   :  { %v627_v56 = vsel %vm624_vm0, %v626_v53, %v622_v54 }
 0x7e2   :  { %v629_v57 = vmul.f32 2.0, %v627_v56  ;;  %v631_v8 = vmul.f32 %v627_v56, %v1963_v62 }
 0x7e4   :  { %v1499_v58 = vadd.f32 -1.0, %v629_v57 }
 0x7e6   :  { %633 = vrot.lane.b32.xlu2 %v1499_v58, %s1647_s18 }
 0x840   :  { %v634_v63 = vpop.permute.xlu2 %633 }
 0x841   :  { %v636_v0 = vmul.f32 %v634_v63, %v627_v56 }
 0x843   :  { %638 = vrot.lane.b32.xlu1 %v636_v0, %s1648_s19 }
 0x84e   :  { %v672_v1 = vpop.permute.xlu0 %671 }
 0x84f   :  { %v674_v4 = vmul.f32 %v672_v1, %v665_v42 }
 0x851   :  { %676 = vrot.lane.b32.xlu2 %v674_v4, %s1648_s19 }
 0x8ab   :  { %v677_v51 = vpop.permute.xlu2 %676 }
 0x8ac   :  { %v1996_v6 = vadd.f32 %v677_v51, %v669_v5 }
 0x8ae   :  { %1583 = vtanh.f32 %v1996_v6 }
 0x8b4   :  { %v1584_v7 = vpop.eup %1583 }
 0x8b5   :  { %v639_v55 = vpop.permute.xlu1 %638  ;;  %682 = vrot.lane.b32.xlu1 %v1584_v7, %s1647_s18 }
 0x8b6   :  { %v2001_v9 = vadd.f32 %v639_v55, %v631_v8 }
 0x8b8   :  { %1585 = vtanh.f32 %v2001_v9 }
 0x8be   :  { %v1586_v10 = vpop.eup %1585 }
 0x8bf   :  { %644 = vrot.lane.b32.xlu0 %v1586_v10, %s1647_s18 }
 0x927   :  { %v683_v11 = vpop.permute.xlu1 %682 }
 0x928   :  { %v685_v3 = vmul.f32 %v683_v11, %v665_v42 }
 0x92a   :  { %688 = vrot.lane.b32.xlu0 %v685_v3, %s1648_s19 }
 0x931   :  { %v645_v12 = vpop.permute.xlu0 %644 }
 0x932   :  { %v647_v13 = vmul.f32 %v645_v12, %v627_v56 }
 0x934   :  { %714 = vrot.lane.b32.xlu2 %v647_v13, %s1648_s19 }
 0x98e   :  { %v715_v14 = vpop.permute.xlu2 %714 }
 0x98f   :  { %1503 = vmatmul.msk.f32.vlgmr.msrb.gmra.mxu3 %vm99_vm7, %v715_v14 }
 0x990   :  { %1028 = vmatpush.msrb.mxu3 %v1915_v59 }
 0x992   :  { %1029 = vmatpush.msrb.mxu3 %v1920_v24 }
 0x994   :  { %1030 = vmatpush.msrb.mxu3 %v1926_v60 }
 0x996   :  { %1031 = vmatpush.msrb.mxu3 %v1932_v61 }
 0x99c   :  { %v689_v62 = vpop.permute.xlu0 %688 }
 0x99d   :  { %1502 = vmatmul.msk.f32.vlgmr.msrb.gmra.mxu1 %vm99_vm7, %v689_v62  ;;  %1504 = vmatmul.msk.f32.vlgmr.msra.gmra.mxu0 %vm99_vm7, %v689_v62 }
 0x99e   :  { %1002 = vmatpush.msrb.mxu1 %v1772_v29  ;;  %1048 = vmatpush.msra.mxu0 %v1767_v28 }
 0x9a0   :  { %1003 = vmatpush.msrb.mxu1 %v1777_v30  ;;  %1049 = vmatpush.msra.mxu0 %v1783_v31 }
 0x9a2   :  { %1004 = vmatpush.msrb.mxu1 %v1792_v33  ;;  %1050 = vmatpush.msra.mxu0 %v1799_v34 }
 0x9a4   :  { %1005 = vmatpush.msrb.mxu1 %v1805_v35  ;;  %1051 = vmatpush.msra.mxu0 %v1811_v36 }
 0xa12   :  { %v735_v17 = vpop.f32.mrf.mxu3 }
 0xa1a   :  { %v709_v18 = vpop.f32.mrf.mxu1  ;;  %v755_v19 = vpop.f32.mrf.mxu0 }
 0xa1b   :  { %v712_v20 = vadd.f32 %v709_v18, %v191_v16  ;;  %v756_v21 = vadd.f32 %v755_v19, %v735_v17 }
 0xa1d   :  { %v1507_v22 = vmul.f32 -1.442695, %v712_v20  ;;  %v758_v23 = vadd.f32 %v1854_v48, %v756_v21 }
 0xa1f   :  { %1587 = vpow2.f32 %v1507_v22  ;;  %v1505_v25 = vmul.f32 -1.442695, %v758_v23 }
 0xa21   :  { %1589 = vpow2.f32 %v1505_v25 }
 0xa25   :  { %v1588_v26 = vpop.eup %1587 }
 0xa26   :  { %v800_v27 = vadd.f32 1.0, %v1588_v26 }
 0xa27   :  { %v1590_v32 = vpop.eup %1589 }
 0xa28   :  { %1591 = vrcp.f32 %v800_v27  ;;  %v762_v37 = vadd.f32 1.0, %v1590_v32  ;;  %v812_v42 = vand.u32 2147483648, %v800_v27  ;;  %v810_v45 = vand.u32 2147483647, %v800_v27 }
 0xa29   :  { %vm806_vm2 = vweird.f32 %v800_v27 }
 0xa2a   :  { %1593 = vrcp.f32 %v762_v37  ;;  %v774_v46 = vand.u32 2147483648, %v762_v37  ;;  %v772_v50 = vand.u32 2147483647, %v762_v37  ;;  %v813_v52 = vor.u32 1.1754944e-38, %v812_v42 }
 0xa2b   :  { %vm811_vm5 = vcmp.eq.f32.partialorder %v810_v45, 8.507059e+37  ;;  %vm768_vm6 = vweird.f32 %v762_v37 }
 0xa2c   :  { %v775_v57 = vor.u32 1.1754944e-38, %v774_v46  ;;  %vm773_vm9 = vcmp.eq.f32.partialorder %v772_v50, 8.507059e+37 }
 0xa2e   :  { %v1592_v38 = vpop.eup %1591 }
 0xa2f   :  { %v802_v39 = vmul.f32 %v1592_v38, %v800_v27  ;;  %vm807_vm1 = vweird.f32 %v1592_v38 }
 0xa30   :  { %v1594_v2 = vpop.eup %1593  ;;  %vm808_vm4 = vmor %vm806_vm2, %vm807_vm1 }
 0xa31   :  { %v803_v40 = vsub.f32 1.0, %v802_v39  ;;  %v764_v41 = vmul.f32 %v1594_v2, %v762_v37  ;;  %vm769_vm3 = vweird.f32 %v1594_v2 }
 0xa32   :  { %vm770_vm8 = vmor %vm768_vm6, %vm769_vm3 }
 0xa33   :  { %v765_v43 = vsub.f32 1.0, %v764_v41  ;;  %v804_v44 = vmul.f32 %v1592_v38, %v803_v40 }
 0xa35   :  { %v805_v47 = vadd.f32 %v1592_v38, %v804_v44  ;;  %v766_v49 = vmul.f32 %v1594_v2, %v765_v43 }
 0xa37   :  { %v809_v53 = vsel %vm808_vm4, %v1592_v38, %v805_v47  ;;  %v767_v54 = vadd.f32 %v1594_v2, %v766_v49 }
 0xa38   :  { %v814_v56 = vsel %vm811_vm5, %v813_v52, %v809_v53 }
 0xa39   :  { %v816_v58 = vmul.f32 2.0, %v814_v56  ;;  %v771_v63 = vsel %vm770_vm8, %v1594_v2, %v767_v54  ;;  %v818_v10 = vmul.f32 %v814_v56, %v1996_v6 }
 0xa3a   :  { %v776_v0 = vsel %vm773_vm9, %v775_v57, %v771_v63 }
 0xa3b   :  { %v1508_v1 = vadd.f32 -1.0, %v816_v58  ;;  %v778_v4 = vmul.f32 2.0, %v776_v0  ;;  %v780_v13 = vmul.f32 %v776_v0, %v2001_v9 }
 0xa3d   :  { %820 = vrot.lane.b32.xlu2 %v1508_v1, %s1647_s18  ;;  %v1506_v5 = vadd.f32 -1.0, %v778_v4 }
 0xa3f   :  { %782 = vrot.lane.b32.xlu1 %v1506_v5, %s1647_s18 }
 0xa97   :  { %v821_v51 = vpop.permute.xlu2 %820 }
 0xa98   :  { %v823_v7 = vmul.f32 %v821_v51, %v814_v56 }
 0xa9a   :  { %825 = vrot.lane.b32.xlu1 %v823_v7, %s1648_s19 }
 0xab1   :  { %v783_v8 = vpop.permute.xlu1 %782 }
 0xab2   :  { %v785_v55 = vmul.f32 %v783_v8, %v776_v0 }
 0xab4   :  { %787 = vrot.lane.b32.xlu0 %v785_v55, %s1648_s19 }
 0xb0c   :  { %v826_v11 = vpop.permute.xlu1 %825 }
 0xb0d   :  { %v2029_v3 = vadd.f32 %v826_v11, %v818_v10 }
 0xb0f   :  { %1595 = vtanh.f32 %v2029_v3 }
 0xb15   :  { %v1596_v12 = vpop.eup %1595 }
 0xb16   :  { %831 = vrot.lane.b32.xlu0 %v1596_v12, %s1647_s18 }
 0xb26   :  { %v788_v14 = vpop.permute.xlu0 %787 }
 0xb27   :  { %v2034_v62 = vadd.f32 %v788_v14, %v780_v13 }
 0xb29   :  { %1597 = vtanh.f32 %v2034_v62 }
 0xb2f   :  { %v1598_v15 = vpop.eup %1597 }
 0xb30   :  { %793 = vrot.lane.b32.xlu2 %v1598_v15, %s1647_s18 }
 0xb88   :  { %v832_v16 = vpop.permute.xlu0 %831 }
 0xb89   :  { %v834_v6 = vmul.f32 %v832_v16, %v814_v56 }
 0xb8a   :  { %v794_v17 = vpop.permute.xlu2 %793 }
 0xb8b   :  { %v796_v18 = vmul.f32 %v794_v17, %v776_v0  ;;  %837 = vrot.lane.b32.xlu2 %v834_v6, %s1648_s19 }
 0xb8d   :  { %863 = vrot.lane.b32.xlu1 %v796_v18, %s1648_s19  ;;  %v1642_v18 = vld [vmem:[%s2182_s9 + $0x18] sm:$0xff] }
 0xbe5   :  { %v838_v19 = vpop.permute.xlu2 %837 }
 0xbe6   :  { %1509 = vmatmul.msk.f32.vlgmr.msra.gmra.mxu1 %vm99_vm7, %v838_v19  ;;  %1511 = vmatmul.msk.f32.vlgmr.msrb.gmra.mxu0 %vm99_vm7, %v838_v19  ;;  %v1643_v19 = vld [vmem:[%s2182_s9 + $0x10] sm:$0xff] }
 0xbe7   :  { %1151 = vmatpush.msra.mxu1 %v1772_v29  ;;  %1197 = vmatpush.msrb.mxu0 %v1767_v28  ;;  %v193_v28 = vpop.f32.mrf.mxu2  ;;  %v2058_v29 = vld [vmem:[%s2179_s7] ss:$0 sm:$0xff] }
 0xbe9   :  { %1152 = vmatpush.msra.mxu1 %v1777_v30  ;;  %1198 = vmatpush.msrb.mxu0 %v1783_v31  ;;  %v194_v30 = vadd.f32 %v2058_v29, %v193_v28 }
 0xbeb   :  { %1153 = vmatpush.msra.mxu1 %v1792_v33  ;;  %1199 = vmatpush.msrb.mxu0 %v1799_v34 }
 0xbed   :  { %1154 = vmatpush.msra.mxu1 %v1805_v35  ;;  %1200 = vmatpush.msrb.mxu0 %v1811_v36 }
 0xbff   :  { %v864_v9 = vpop.permute.xlu1 %863 }
 0xc00   :  { %1510 = vmatmul.msk.f32.vlgmr.msra.gmra.mxu3 %vm99_vm7, %v864_v9 }
 0xc01   :  { %1177 = vmatpush.msra.mxu3 %v1915_v59 }
 0xc03   :  { %1178 = vmatpush.msra.mxu3 %v1920_v24 }
 0xc05   :  { %1179 = vmatpush.msra.mxu3 %v1926_v60 }
 0xc07   :  { %1180 = vmatpush.msra.mxu3 %v1932_v61 }
 0xc63   :  { %v858_v31 = vpop.f32.mrf.mxu1  ;;  %v904_v2 = vpop.f32.mrf.mxu0 }
 0xc64   :  { %v861_v33 = vadd.f32 %v858_v31, %v194_v30 }
 0xc66   :  { %v1514_v34 = vmul.f32 -1.442695, %v861_v33 }
 0xc68   :  { %1599 = vpow2.f32 %v1514_v34 }
 0xc6e   :  { %v1600_v35 = vpop.eup %1599 }
 0xc6f   :  { %v949_v36 = vadd.f32 1.0, %v1600_v35 }
 0xc71   :  { %1601 = vrcp.f32 %v949_v36  ;;  %v961_v23 = vand.u32 2147483648, %v949_v36  ;;  %v959_v26 = vand.u32 2147483647, %v949_v36  ;;  %vm955_vm11 = vweird.f32 %v949_v36 }
 0xc73   :  { %v962_v32 = vor.u32 1.1754944e-38, %v961_v23  ;;  %vm960_vm13 = vcmp.eq.f32.partialorder %v959_v26, 8.507059e+37 }
 0xc77   :  { %v1602_v20 = vpop.eup %1601 }
 0xc78   :  { %v951_v21 = vmul.f32 %v1602_v20, %v949_v36  ;;  %vm956_vm10 = vweird.f32 %v1602_v20 }
 0xc79   :  { %vm957_vm12 = vmor %vm955_vm11, %vm956_vm10 }
 0xc7a   :  { %v952_v22 = vsub.f32 1.0, %v951_v21 }
 0xc7c   :  { %v953_v25 = vmul.f32 %v1602_v20, %v952_v22 }
 0xc7e   :  { %v954_v27 = vadd.f32 %v1602_v20, %v953_v25 }
 0xc80   :  { %v958_v37 = vsel %vm957_vm12, %v1602_v20, %v954_v27 }
 0xc81   :  { %v963_v38 = vsel %vm960_vm13, %v962_v32, %v958_v37 }
 0xc82   :  { %v965_v39 = vmul.f32 2.0, %v963_v38  ;;  %v967_v7 = vmul.f32 %v963_v38, %v2029_v3 }
 0xc83   :  { %v884_v40 = vpop.f32.mrf.mxu3 }
 0xc84   :  { %v905_v41 = vadd.f32 %v904_v2, %v884_v40  ;;  %v1515_v42 = vadd.f32 -1.0, %v965_v39  ;;  %v2102_v40 = vld [vmem:[%s2185_s11] ss:$0 sm:$0xff] }
 0xc86   :  { %v907_v43 = vadd.f32 %v1854_v48, %v905_v41  ;;  %969 = vrot.lane.b32.xlu1 %v1515_v42, %s1647_s18 }
 0xc88   :  { %v1512_v44 = vmul.f32 -1.442695, %v907_v43 }
 0xc8a   :  { %1603 = vpow2.f32 %v1512_v44 }
 0xc90   :  { %v1604_v45 = vpop.eup %1603 }
 0xc91   :  { %v911_v46 = vadd.f32 1.0, %v1604_v45 }
 0xc93   :  { %1605 = vrcp.f32 %v911_v46  ;;  %v923_v52 = vand.u32 2147483648, %v911_v46  ;;  %v921_v54 = vand.u32 2147483647, %v911_v46  ;;  %vm917_vm15 = vweird.f32 %v911_v46 }
 0xc95   :  { %v924_v57 = vor.u32 1.1754944e-38, %v923_v52  ;;  %vm922_vm1 = vcmp.eq.f32.partialorder %v921_v54, 8.507059e+37 }
 0xc99   :  { %v1606_v47 = vpop.eup %1605 }
 0xc9a   :  { %v913_v49 = vmul.f32 %v1606_v47, %v911_v46  ;;  %vm918_vm14 = vweird.f32 %v1606_v47 }
 0xc9b   :  { %vm919_vm0 = vmor %vm917_vm15, %vm918_vm14 }
 0xc9c   :  { %v914_v50 = vsub.f32 1.0, %v913_v49 }
 0xc9e   :  { %v915_v53 = vmul.f32 %v1606_v47, %v914_v50 }
 0xca0   :  { %v916_v56 = vadd.f32 %v1606_v47, %v915_v53 }
 0xca2   :  { %v920_v58 = vsel %vm919_vm0, %v1606_v47, %v916_v56 }
 0xca3   :  { %v925_v48 = vsel %vm922_vm1, %v924_v57, %v920_v58 }
 0xca4   :  { %v927_v63 = vmul.f32 2.0, %v925_v48  ;;  %v929_v11 = vmul.f32 %v925_v48, %v2034_v62 }
 0xca6   :  { %v1513_v0 = vadd.f32 -1.0, %v927_v63 }
 0xca8   :  { %931 = vrot.lane.b32.xlu0 %v1513_v0, %s1647_s18 }
 0xcf8   :  { %v970_v1 = vpop.permute.xlu1 %969 }
 0xcf9   :  { %v972_v4 = vmul.f32 %v970_v1, %v963_v38 }
 0xcfb   :  { %974 = vrot.lane.b32.xlu0 %v972_v4, %s1648_s19 }
 0xd1a   :  { %v932_v5 = vpop.permute.xlu0 %931 }
 0xd1b   :  { %v934_v51 = vmul.f32 %v932_v5, %v925_v48 }
 0xd1d   :  { %936 = vrot.lane.b32.xlu2 %v934_v51, %s1648_s19 }
 0xd6d   :  { %v975_v8 = vpop.permute.xlu0 %974 }
 0xd6e   :  { %v2067_v55 = vadd.f32 %v975_v8, %v967_v7 }
 0xd70   :  { %1607 = vtanh.f32 %v2067_v55 }
 0xd76   :  { %v1608_v10 = vpop.eup %1607 }
 0xd77   :  { %v937_v12 = vpop.permute.xlu2 %936  ;;  %980 = vrot.lane.b32.xlu2 %v1608_v10, %s1647_s18 }
 0xd78   :  { %v2072_v13 = vadd.f32 %v937_v12, %v929_v11 }
 0xd7a   :  { %1609 = vtanh.f32 %v2072_v13 }
 0xd80   :  { %v1610_v14 = vpop.eup %1609 }
 0xd81   :  { %942 = vrot.lane.b32.xlu1 %v1610_v14, %s1647_s18 }
 0xdd1   :  { %v981_v15 = vpop.permute.xlu2 %980 }
 0xdd2   :  { %v983_v3 = vmul.f32 %v981_v15, %v963_v38 }
 0xdd4   :  { %986 = vrot.lane.b32.xlu1 %v983_v3, %s1648_s19 }
 0xdf3   :  { %v943_v16 = vpop.permute.xlu1 %942 }
 0xdf4   :  { %v945_v6 = vmul.f32 %v943_v16, %v925_v48 }
 0xdf6   :  { %1012 = vrot.lane.b32.xlu0 %v945_v6, %s1648_s19 }
 0xe46   :  { %v987_v17 = vpop.permute.xlu1 %986 }
 0xe47   :  { %1516 = vmatmul.msk.f32.vlgmr.msrb.gmra.mxu1 %vm99_vm7, %v987_v17  ;;  %1518 = vmatmul.msk.f32.vlgmr.msra.gmra.mxu0 %vm99_vm7, %v987_v17 }
 0xe48   :  { %1299 = vmatpush.msrb.mxu1 %v1915_v59  ;;  %v1644_v59 = vld [vmem:[%s2182_s9 + $0x8] sm:$0xff] }
 0xe4a   :  { %1300 = vmatpush.msrb.mxu1 %v1920_v24  ;;  %v1645_v24 = vld [vmem:[%s2182_s9] sm:$0xff] }
 0xe4c   :  { %1301 = vmatpush.msrb.mxu1 %v1926_v60  ;;  %v196_v60 = vpop.f32.mrf.mxu2 }
 0xe4e   :  { %1302 = vmatpush.msrb.mxu1 %v1932_v61  ;;  %v197_v61 = vadd.f32 %v2058_v29, %v196_v60 }
 0xe54   :  { %v199_v17 = vpop.f32.mrf.mxu2 }
 0xe68   :  { %v1013_v62 = vpop.permute.xlu0 %1012 }
 0xe69   :  { %1517 = vmatmul.msk.f32.vlgmr.msrb.gmra.mxu3 %vm99_vm7, %v1013_v62  ;;  %v200_v62 = vadd.f32 %v2058_v29, %v199_v17 }
 0xe6a   :  { %1324 = vmatpush.msrb.mxu3 %v1642_v18 }
 0xe6c   :  { %1325 = vmatpush.msrb.mxu3 %v1643_v19 }
 0xe6e   :  { %1326 = vmatpush.msrb.mxu3 %v1644_v59 }
 0xe70   :  { %1327 = vmatpush.msrb.mxu3 %v1645_v24 }
 0xec4   :  { %v1007_v9 = vpop.f32.mrf.mxu1  ;;  %v1053_v38 = vpop.f32.mrf.mxu0 }
 0xec5   :  { %v1010_v28 = vadd.f32 %v1007_v9, %v197_v61 }
 0xec7   :  { %v1521_v30 = vmul.f32 -1.442695, %v1010_v28 }
 0xec9   :  { %1611 = vpow2.f32 %v1521_v30 }
 0xecf   :  { %v1612_v31 = vpop.eup %1611 }
 0xed0   :  { %v1098_v33 = vadd.f32 1.0, %v1612_v31 }
 0xed2   :  { %1613 = vrcp.f32 %v1098_v33  ;;  %v1110_v20 = vand.u32 2147483648, %v1098_v33  ;;  %v1108_v22 = vand.u32 2147483647, %v1098_v33  ;;  %vm1104_vm3 = vweird.f32 %v1098_v33 }
 0xed4   :  { %v1111_v25 = vor.u32 1.1754944e-38, %v1110_v20  ;;  %vm1109_vm5 = vcmp.eq.f32.partialorder %v1108_v22, 8.507059e+37 }
 0xed8   :  { %v1614_v34 = vpop.eup %1613 }
 0xed9   :  { %v1100_v35 = vmul.f32 %v1614_v34, %v1098_v33  ;;  %vm1105_vm2 = vweird.f32 %v1614_v34 }
 0xeda   :  { %vm1106_vm4 = vmor %vm1104_vm3, %vm1105_vm2 }
 0xedb   :  { %v1101_v36 = vsub.f32 1.0, %v1100_v35 }
 0xedd   :  { %v1102_v21 = vmul.f32 %v1614_v34, %v1101_v36 }
 0xedf   :  { %v1103_v23 = vadd.f32 %v1614_v34, %v1102_v21 }
 0xee1   :  { %v1107_v26 = vsel %vm1106_vm4, %v1614_v34, %v1103_v23 }
 0xee2   :  { %v1112_v27 = vsel %vm1109_vm5, %v1111_v25, %v1107_v26 }
 0xee3   :  { %v1114_v32 = vmul.f32 2.0, %v1112_v27  ;;  %v1116_v5 = vmul.f32 %v1112_v27, %v2067_v55 }
 0xee5   :  { %v1522_v37 = vadd.f32 -1.0, %v1114_v32 }
 0xee7   :  { %1118 = vrot.lane.b32.xlu0 %v1522_v37, %s1647_s18 }
 0xeec   :  { %v1033_v39 = vpop.f32.mrf.mxu3 }
 0xeed   :  { %v1054_v2 = vadd.f32 %v1053_v38, %v1033_v39 }
 0xeef   :  { %v1056_v41 = vadd.f32 %v2102_v40, %v1054_v2 }
 0xef1   :  { %v1519_v42 = vmul.f32 -1.442695, %v1056_v41 }
 0xef3   :  { %1615 = vpow2.f32 %v1519_v42 }
 0xef9   :  { %v1616_v43 = vpop.eup %1615 }
 0xefa   :  { %v1060_v44 = vadd.f32 1.0, %v1616_v43 }
 0xefc   :  { %1617 = vrcp.f32 %v1060_v44  ;;  %v1072_v49 = vand.u32 2147483648, %v1060_v44  ;;  %v1070_v52 = vand.u32 2147483647, %v1060_v44  ;;  %vm1066_vm8 = vweird.f32 %v1060_v44 }
 0xefe   :  { %v1073_v54 = vor.u32 1.1754944e-38, %v1072_v49  ;;  %vm1071_vm10 = vcmp.eq.f32.partialorder %v1070_v52, 8.507059e+37 }
 0xf02   :  { %v1618_v45 = vpop.eup %1617 }
 0xf03   :  { %v1062_v46 = vmul.f32 %v1618_v45, %v1060_v44  ;;  %vm1067_vm6 = vweird.f32 %v1618_v45 }
 0xf04   :  { %vm1068_vm9 = vmor %vm1066_vm8, %vm1067_vm6 }
 0xf05   :  { %v1063_v47 = vsub.f32 1.0, %v1062_v46 }
 0xf07   :  { %v1064_v50 = vmul.f32 %v1618_v45, %v1063_v47 }
 0xf09   :  { %v1065_v53 = vadd.f32 %v1618_v45, %v1064_v50 }
 0xf0b   :  { %v1069_v56 = vsel %vm1068_vm9, %v1618_v45, %v1065_v53 }
 0xf0c   :  { %v1074_v57 = vsel %vm1071_vm10, %v1073_v54, %v1069_v56 }
 0xf0d   :  { %v1076_v58 = vmul.f32 2.0, %v1074_v57  ;;  %v1078_v10 = vmul.f32 %v1074_v57, %v2072_v13 }
 0xf0f   :  { %v1520_v48 = vadd.f32 -1.0, %v1076_v58 }
 0xf11   :  { %1080 = vrot.lane.b32.xlu2 %v1520_v48, %s1647_s18 }
 0xf59   :  { %v1119_v63 = vpop.permute.xlu0 %1118 }
 0xf5a   :  { %v1121_v0 = vmul.f32 %v1119_v63, %v1112_v27 }
 0xf5c   :  { %1123 = vrot.lane.b32.xlu2 %v1121_v0, %s1648_s19 }
 0xf6b   :  { %v1081_v1 = vpop.permute.xlu2 %1080 }
 0xf6c   :  { %v1083_v4 = vmul.f32 %v1081_v1, %v1074_v57 }
 0xf6e   :  { %1085 = vrot.lane.b32.xlu1 %v1083_v4, %s1648_s19 }
 0xfb6   :  { %v1124_v51 = vpop.permute.xlu2 %1123 }
 0xfb7   :  { %v2109_v7 = vadd.f32 %v1124_v51, %v1116_v5 }
 0xfb9   :  { %1619 = vtanh.f32 %v2109_v7 }
 0xfbf   :  { %v1620_v8 = vpop.eup %1619 }
 0xfc0   :  { %1129 = vrot.lane.b32.xlu1 %v1620_v8, %s1647_s18 }
 0xfe0   :  { %v1086_v11 = vpop.permute.xlu1 %1085 }
 0xfe1   :  { %v2114_v12 = vadd.f32 %v1086_v11, %v1078_v10 }
 0xfe3   :  { %1621 = vtanh.f32 %v2114_v12 }
 0xfe9   :  { %v1622_v14 = vpop.eup %1621 }
 0xfea   :  { %1091 = vrot.lane.b32.xlu0 %v1622_v14, %s1647_s18 }
0x1032   :  { %v1130_v15 = vpop.permute.xlu1 %1129 }
0x1033   :  { %v1132_v55 = vmul.f32 %v1130_v15, %v1112_v27 }
0x1035   :  { %1135 = vrot.lane.b32.xlu0 %v1132_v55, %s1648_s19 }
0x105c   :  { %v1092_v3 = vpop.permute.xlu0 %1091 }
0x105d   :  { %v1094_v16 = vmul.f32 %v1092_v3, %v1074_v57 }
0x105f   :  { %1161 = vrot.lane.b32.xlu2 %v1094_v16, %s1648_s19 }
0x10a7   :  { %v1136_v6 = vpop.permute.xlu0 %1135 }
0x10a8   :  { %1523 = vmatmul.msk.f32.vlgmr.msra.gmra.mxu1 %vm99_vm7, %v1136_v6  ;;  %1525 = vmatmul.msk.f32.vlgmr.msrb.gmra.mxu0 %vm99_vm7, %v1136_v6 }
0x10b9   :  { %v1162_v13 = vpop.permute.xlu2 %1161 }
0x10ba   :  { %1524 = vmatmul.msk.f32.vlgmr.msra.gmra.mxu3 %vm99_vm7, %v1162_v13 }
0x1125   :  { %v1156_v18 = vpop.f32.mrf.mxu1  ;;  %v1202_v30 = vpop.f32.mrf.mxu0 }
0x1126   :  { %v1159_v19 = vadd.f32 %v1156_v18, %v200_v62 }
0x1128   :  { %v1528_v59 = vmul.f32 -1.442695, %v1159_v19 }
0x112a   :  { %1623 = vpow2.f32 %v1528_v59 }
0x1130   :  { %v1624_v24 = vpop.eup %1623 }
0x1131   :  { %v1247_v60 = vadd.f32 1.0, %v1624_v24 }
0x1133   :  { %1625 = vrcp.f32 %v1247_v60  ;;  %v1259_v33 = vand.u32 2147483648, %v1247_v60  ;;  %v1257_v36 = vand.u32 2147483647, %v1247_v60  ;;  %vm1253_vm12 = vweird.f32 %v1247_v60 }
0x1135   :  { %v1260_v21 = vor.u32 1.1754944e-38, %v1259_v33  ;;  %vm1258_vm14 = vcmp.eq.f32.partialorder %v1257_v36, 8.507059e+37 }
0x1139   :  { %v1626_v61 = vpop.eup %1625 }
0x113a   :  { %v1249_v9 = vmul.f32 %v1626_v61, %v1247_v60  ;;  %vm1254_vm11 = vweird.f32 %v1626_v61 }
0x113b   :  { %vm1255_vm13 = vmor %vm1253_vm12, %vm1254_vm11 }
0x113c   :  { %v1250_v28 = vsub.f32 1.0, %v1249_v9 }
0x113d   :  { %v1182_v31 = vpop.f32.mrf.mxu3 }
0x113e   :  { %v1203_v34 = vadd.f32 %v1202_v30, %v1182_v31  ;;  %v1251_v35 = vmul.f32 %v1626_v61, %v1250_v28 }
0x1140   :  { %v1205_v20 = vadd.f32 %v2102_v40, %v1203_v34  ;;  %v1252_v29 = vadd.f32 %v1626_v61, %v1251_v35 }
0x1142   :  { %v1526_v22 = vmul.f32 -1.442695, %v1205_v20  ;;  %v1256_v23 = vsel %vm1255_vm13, %v1626_v61, %v1252_v29  ;;  %v1378_v29 = vld [vmem:[%s2190_s13 + $0x18] sm:$0xff] }
0x1143   :  { %v1261_v25 = vsel %vm1258_vm14, %v1260_v21, %v1256_v23  ;;  %v1377_v21 = vld [vmem:[%s2190_s13 + $0x10] sm:$0xff]  ;;  %1396 = vmatpush.msra.mxu0 %v1378_v29  ;;  %v1375_v23 = vld [vmem:[%s2190_s13] sm:$0xff] }
0x1144   :  { %1627 = vpow2.f32 %v1526_v22  ;;  %v1263_v26 = vmul.f32 2.0, %v1261_v25  ;;  %v1265_v57 = vmul.f32 %v1261_v25, %v2109_v7  ;;  %v1376_v22 = vld [vmem:[%s2190_s13 + $0x8] sm:$0xff] }
0x1145   :  { %1397 = vmatpush.msra.mxu0 %v1377_v21 }
0x1146   :  { %v1529_v27 = vadd.f32 -1.0, %v1263_v26 }
0x1147   :  { %1398 = vmatpush.msra.mxu0 %v1376_v22 }
0x1148   :  { %1267 = vrot.lane.b32.xlu1 %v1529_v27, %s1647_s18  ;;  %v1436_v27 = vld [vmem:[%s2192_s15 + $0x18] sm:$0xff] }
0x1149   :  { %1399 = vmatpush.msra.mxu0 %v1375_v23  ;;  %1456 = vmatpush.msra.mxu1 %v1436_v27 }
0x114a   :  { %v1628_v32 = vpop.eup %1627 }
0x114b   :  { %v1209_v37 = vadd.f32 1.0, %v1628_v32 }
0x114d   :  { %1629 = vrcp.f32 %v1209_v37  ;;  %v1221_v41 = vand.u32 2147483648, %v1209_v37  ;;  %v1219_v43 = vand.u32 2147483647, %v1209_v37  ;;  %vm1215_vm0 = vweird.f32 %v1209_v37 }
0x114f   :  { %v1222_v45 = vor.u32 1.1754944e-38, %v1221_v41  ;;  %vm1220_vm2 = vcmp.eq.f32.partialorder %v1219_v43, 8.507059e+37  ;;  %v1424_v41 = vpop.f32.mrf.mxu2 }
0x1153   :  { %v1630_v38 = vpop.eup %1629 }
0x1154   :  { %v1211_v39 = vmul.f32 %v1630_v38, %v1209_v37  ;;  %vm1216_vm15 = vweird.f32 %v1630_v38  ;;  %v1435_v37 = vld [vmem:[%s2192_s15 + $0x10] sm:$0xff] }
0x1155   :  { %vm1217_vm1 = vmor %vm1215_vm0, %vm1216_vm15  ;;  %1457 = vmatpush.msra.mxu1 %v1435_v37 }
0x1156   :  { %v1212_v2 = vsub.f32 1.0, %v1211_v39  ;;  %v1433_v39 = vld [vmem:[%s2192_s15] sm:$0xff] }
0x1158   :  { %v1213_v42 = vmul.f32 %v1630_v38, %v1212_v2  ;;  %v1543_v2 = vld [vmem:[%s2191_s14] ss:$0 sm:$0xff] }
0x115a   :  { %v1214_v44 = vadd.f32 %v1630_v38, %v1213_v42 }
0x115c   :  { %v1218_v46 = vsel %vm1217_vm1, %v1630_v38, %v1214_v44  ;;  %v1434_v38 = vld [vmem:[%s2192_s15 + $0x8] sm:$0xff] }
0x115d   :  { %v1223_v47 = vsel %vm1220_vm2, %v1222_v45, %v1218_v46  ;;  %1458 = vmatpush.msra.mxu1 %v1434_v38  ;;  %v1544_v46 = vld [vmem:[%s2193_s16] ss:$0 sm:$0xff] }
0x115e   :  { %v1225_v49 = vmul.f32 2.0, %v1223_v47  ;;  %v1227_v63 = vmul.f32 %v1223_v47, %v2114_v12 }
0x115f   :  { %1459 = vmatpush.msra.mxu1 %v1433_v39 }
0x1160   :  { %v1527_v50 = vadd.f32 -1.0, %v1225_v49 }
0x1162   :  { %1229 = vrot.lane.b32.xlu2 %v1527_v50, %s1647_s18 }
0x11ba   :  { %v1268_v52 = vpop.permute.xlu1 %1267 }
0x11bb   :  { %v1270_v53 = vmul.f32 %v1268_v52, %v1261_v25 }
0x11bc   :  { %v1230_v54 = vpop.permute.xlu2 %1229 }
0x11bd   :  { %v1232_v56 = vmul.f32 %v1230_v54, %v1223_v47  ;;  %1272 = vrot.lane.b32.xlu0 %v1270_v53, %s1648_s19 }
0x11bf   :  { %1234 = vrot.lane.b32.xlu1 %v1232_v56, %s1648_s19 }
0x122f   :  { %v1273_v58 = vpop.permute.xlu0 %1272 }
0x1230   :  { %v1275_v48 = vadd.f32 %v1273_v58, %v1265_v57 }
0x1231   :  { %v1235_v0 = vpop.permute.xlu1 %1234 }
0x1232   :  { %1631 = vtanh.f32 %v1275_v48  ;;  %v1237_v1 = vadd.f32 %v1235_v0, %v1227_v63 }
0x1234   :  { %1633 = vtanh.f32 %v1237_v1 }
0x1238   :  { %v1632_v4 = vpop.eup %1631 }
0x1239   :  { %1278 = vrot.lane.b32.xlu2 %v1632_v4, %s1647_s18 }
0x123a   :  { %v1634_v5 = vpop.eup %1633 }
0x123b   :  { %1240 = vrot.lane.b32.xlu0 %v1634_v5, %s1647_s18 }
0x1293   :  { %v1279_v51 = vpop.permute.xlu2 %1278 }
0x1294   :  { %v1281_v8 = vmul.f32 %v1279_v51, %v1261_v25 }
0x1296   :  { %1308 = vrot.lane.b32.xlu1 %v1281_v8, %s1648_s19 }
0x12ad   :  { %v1241_v10 = vpop.permute.xlu0 %1240 }
0x12ae   :  { %v1243_v7 = vmul.f32 %v1241_v10, %v1223_v47 }
0x12b0   :  { %1283 = vrot.lane.b32.xlu2 %v1243_v7, %s1648_s19 }
0x1308   :  { %v1309_v11 = vpop.permute.xlu1 %1308 }
0x1309   :  { %1531 = vmatmul.msk.f32.vlgmr.msrb.gmra.mxu3 %vm99_vm7, %v1309_v11 }
0x130a   :  { %v1284_v12 = vpop.permute.xlu2 %1283 }
0x130b   :  { %1530 = vmatmul.msk.f32.vlgmr.msrb.gmra.mxu1 %vm99_vm7, %v1284_v12 }
0x1388   :  { %v1304_v14 = vpop.f32.mrf.mxu1 }
0x138c   :  { %v1329_v15 = vpop.f32.mrf.mxu3 }
0x138d   :  { %v1330_v55 = vadd.f32 %v1329_v15, %v1304_v14 }
0x138f   :  { %v1332_v3 = vadd.f32 %v2102_v40, %v1330_v55 }
0x1391   :  { %v1532_v16 = vmul.f32 -1.442695, %v1332_v3 }
0x1393   :  { %1635 = vpow2.f32 %v1532_v16 }
0x1399   :  { %v1636_v6 = vpop.eup %1635 }
0x139a   :  { %v1336_v13 = vadd.f32 1.0, %v1636_v6 }
0x139c   :  { %1637 = vrcp.f32 %v1336_v13  ;;  %v1348_v19 = vand.u32 2147483648, %v1336_v13  ;;  %v1346_v24 = vand.u32 2147483647, %v1336_v13  ;;  %vm1342_vm4 = vweird.f32 %v1336_v13 }
0x139e   :  { %v1349_v61 = vor.u32 1.1754944e-38, %v1348_v19  ;;  %vm1347_vm6 = vcmp.eq.f32.partialorder %v1346_v24, 8.507059e+37 }
0x13a2   :  { %v1638_v17 = vpop.eup %1637 }
0x13a3   :  { %v1338_v62 = vmul.f32 %v1638_v17, %v1336_v13  ;;  %vm1343_vm3 = vweird.f32 %v1638_v17 }
0x13a4   :  { %vm1344_vm5 = vmor %vm1342_vm4, %vm1343_vm3 }
0x13a5   :  { %v1339_v18 = vsub.f32 1.0, %v1338_v62 }
0x13a7   :  { %v1340_v59 = vmul.f32 %v1638_v17, %v1339_v18 }
0x13a9   :  { %v1341_v60 = vadd.f32 %v1638_v17, %v1340_v59 }
0x13ab   :  { %v1345_v9 = vsel %vm1344_vm5, %v1638_v17, %v1341_v60 }
0x13ac   :  { %v1350_v28 = vsel %vm1347_vm6, %v1349_v61, %v1345_v9 }
0x13ad   :  { %v1352_v40 = vmul.f32 2.0, %v1350_v28  ;;  %v1354_v34 = vmul.f32 %v1350_v28, %v1237_v1 }
0x13af   :  { %v1533_v30 = vadd.f32 -1.0, %v1352_v40 }
0x13b1   :  { %1356 = vrot.lane.b32.xlu0 %v1533_v30, %s1647_s18 }
0x1423   :  { %v1357_v31 = vpop.permute.xlu0 %1356 }
0x1424   :  { %v1359_v33 = vmul.f32 %v1357_v31, %v1350_v28 }
0x1426   :  { %1361 = vrot.lane.b32.xlu1 %v1359_v33, %s1648_s19 }
0x1498   :  { %v1362_v35 = vpop.permute.xlu1 %1361 }
0x1499   :  { %v1364_v36 = vadd.f32 %v1362_v35, %v1354_v34 }
0x149b   :  { %1639 = vtanh.f32 %v1364_v36 }
0x14a1   :  { %v1640_v20 = vpop.eup %1639 }
0x14a2   :  { %1367 = vrot.lane.b32.xlu2 %v1640_v20, %s1647_s18 }
0x14fc   :  { %v1368_v25 = vpop.permute.xlu2 %1367 }
0x14fd   :  { %v1370_v26 = vmul.f32 %v1368_v25, %v1350_v28 }
0x14ff   :  { %1380 = vrot.lane.b32.xlu0 %v1370_v26, %s1648_s19 }
0x1571   :  { %v1381_v32 = vpop.permute.xlu0 %1380 }
0x1572   :  { %1534 = vmatmul.msk.f32.vlgmr.msra.gmra.mxu0 %vm99_vm7, %v1381_v32 }
0x15ef   :  { %v1401_v42 = vpop.f32.mrf.mxu0 }
0x15f0   :  { %v1425_v43 = vadd.f32 %v1424_v41, %v1401_v42 }
0x15f2   :  { %v1431_v44 = vadd.f32 %v1543_v2, %v1425_v43 }
0x15f4   :  { %v1432_v45 = vmax.f32 %v1431_v44, 0.0 }
0x15f6   :  { %1536 = vmatmul.msk.f32.vlgmr.msra.gmra.mxu1 %vm99_vm7, %v1432_v45 }
0x1673   :  { %v1461_v47 = vpop.f32.mrf.mxu1 }
0x1674   :  { %v1462_v49 = vadd.f32 %v1544_v46, %v1461_v47 }
0x1676   :  { %1464 = vst [vmem:[%s2194_s17] sm:$0xff] %v1462_v49 }

</bundles_post_ra>
